<compile_context>
chip_gen: v5e
topology: v5e:2x2
jax: 0.10.0
libtpu: 0.0.40
codegen_flags: <defaults>
</compile_context>

<pallas_src>
import math
import numpy as np
import jax
import jax.numpy as jnp
from jax.experimental import pallas as pl
from jax.experimental.pallas import tpu as pltpu

FILTER_LEN = 8  # db4
# Deterministic parameter init (matches nn.Parameter init values in __init__).
DEC_LO = jnp.array([0.0107772507, 0.0328830116, 0.0308413818, -0.1870348117,
                    -0.0279837694, 0.6308807679, 0.7148465706, 0.2303778133],
                   dtype=jnp.float32)
DEC_HI = jnp.array([-0.2303778133, 0.7148465706, -0.6308807679, -0.0279837694,
                    0.1870348117, 0.0308413818, -0.0328830116, 0.0107772507],
                   dtype=jnp.float32)
# low_pass / high_pass parameters (1,1,32)*0.7/0.3 are only used by the FFT
# fallback path, which is not exercised for seq_length >= 16.


# ----------------------------- Pallas kernel ---------------------------------
def _make_fused_dwt_kernel(level_lens, out_lens):
    """Builds a kernel that runs all DWT levels for one (batch, d_tile) block.

    level_lens[l] : static input length of level l
    out_lens[l]   : static output length of level l == (level_lens[l]+7)//2

    Per level, the doubly-reflect-padded signal
      p2 = [x0 x1 x2 x3 x2 x1 | x0 .. x_{L-1} | x_{L-2} x_{L-3} x_{L-4}
            x_{L-3} x_{L-2} x_{L-1} x_{L-2}]                (length L+13)
    is materialized directly in polyphase form pe[k]=p2[2k], po[k]=p2[2k+1]
    inside VMEM, and the stride-2 conv becomes
      out[i] = sum_m f[2m]*pe[i+m] + f[2m+1]*po[i+m]        (unit-stride taps).
    """
    n_levels = len(level_lens)
    n_taps = FILTER_LEN // 2

    def kernel(lo_ref, hi_ref, x_ref, *rest):
        approx_ref = rest[0]
        detail_refs = rest[1:1 + n_levels]
        cur_ref, pe_ref, po_ref = rest[1 + n_levels:]

        # Hoist the 16 filter scalars out of the unrolled tap loops (one SMEM
        # read each, instead of re-reading inside every level / tap).
        lo = [lo_ref[j] for j in range(FILTER_LEN)]
        hi = [hi_ref[j] for j in range(FILTER_LEN)]

        for lvl in range(n_levels):
            L = level_lens[lvl]
            s_out = out_lens[lvl]
            n_even = (L + 1) // 2
            n_odd = L // 2
            # Level 0 reads straight from the input block; later levels read the
            # running approximation kept in VMEM (no HBM round trips).
            src = x_ref if lvl == 0 else cur_ref

            # ---- build padded polyphase components in VMEM ----
            # left halo of p2: [x0, x1, x2, x3, x2, x1]
            pe_ref[pl.ds(0, 1), :] = src[pl.ds(0, 1), :]   # p2[0] = x0
            po_ref[pl.ds(0, 1), :] = src[pl.ds(1, 1), :]   # p2[1] = x1
            pe_ref[pl.ds(1, 1), :] = src[pl.ds(2, 1), :]   # p2[2] = x2
            po_ref[pl.ds(1, 1), :] = src[pl.ds(3, 1), :]   # p2[3] = x3
            pe_ref[pl.ds(2, 1), :] = src[pl.ds(2, 1), :]   # p2[4] = x2
            po_ref[pl.ds(2, 1), :] = src[pl.ds(1, 1), :]   # p2[5] = x1
            # core: even / odd rows of the current approx (stride-2 VMEM reads,
            # unit-stride stores — the polyphase split never touches HBM).
            pe_ref[pl.ds(3, n_even), :] = src[pl.ds(0, n_even, stride=2), :]
            po_ref[pl.ds(3, n_odd), :] = src[pl.ds(1, n_odd, stride=2), :]
            # right halo of p2: positions L+6 .. L+12 map to these x rows.
            for t, si in enumerate((L - 2, L - 3, L - 4, L - 3,
                                    L - 2, L - 1, L - 2)):
                pos = L + 6 + t
                dst = pe_ref if pos % 2 == 0 else po_ref
                dst[pl.ds(pos // 2, 1), :] = src[pl.ds(si, 1), :]

            # ---- fully unrolled 8-tap / stride-2 depthwise conv (polyphase) ----
            acc_a = None
            acc_d = None
            for m in range(n_taps):
                se = pe_ref[pl.ds(m, s_out), :]
                so = po_ref[pl.ds(m, s_out), :]
                ca = lo[2 * m] * se + lo[2 * m + 1] * so
                cd = hi[2 * m] * se + hi[2 * m + 1] * so
                acc_a = ca if acc_a is None else acc_a + ca
                acc_d = cd if acc_d is None else acc_d + cd

            # detail goes straight to its HBM output block; the approximation
            # either feeds the next level (VMEM) or the approx output (last level).
            detail_refs[lvl][...] = acc_d
            if lvl == n_levels - 1:
                approx_ref[...] = acc_a
            else:
                cur_ref[pl.ds(0, s_out), :] = acc_a

    return kernel


# ------------------------------ wrapper ---------------------------------------
def _round_up(n, m):
    return -(-n // m) * m


def _pick_lane_tile(d):
    """Lane tile: multiple of 128 when D allows, otherwise full D."""
    for td in (512, 384, 256, 128):
        if d % td == 0:
            return td
    return d


def fused_dwt_pallas(x, dec_lo, dec_hi, level_lens, out_lens):
    """All DWT levels in a single pallas_call. Returns (approx, [details])."""
    B, S, D = x.shape
    n_levels = len(level_lens)
    TD = _pick_lane_tile(D)
    grid = (B, D // TD)

    kernel = _make_fused_dwt_kernel(tuple(level_lens), tuple(out_lens))

    out_shape = tuple(
        [jax.ShapeDtypeStruct((B, out_lens[-1], D), jnp.float32)]
        + [jax.ShapeDtypeStruct((B, out_lens[l], D), jnp.float32)
           for l in range(n_levels)])
    # Leading batch dim squeezed (None) so the kernel sees clean 2-D tiles.
    out_specs = tuple(
        [pl.BlockSpec((None, out_lens[-1], TD), lambda b, d: (b, 0, d))]
        + [pl.BlockSpec((None, out_lens[l], TD), lambda b, d: (b, 0, d))
           for l in range(n_levels)])

    # Running approx scratch only ever holds an intermediate level output
    # (level-0 output is the largest); padded polyphase buffers need
    # ceil((S+13)/2) rows for level 0.
    cur_rows = _round_up(max(out_lens[0], 8), 8)
    pe_rows = _round_up((S + 14) // 2, 8)

    outs = pl.pallas_call(
        kernel,
        out_shape=out_shape,
        grid=grid,
        in_specs=[
            pl.BlockSpec(memory_space=pltpu.MemorySpace.SMEM),   # dec_lo (8,)
            pl.BlockSpec(memory_space=pltpu.MemorySpace.SMEM),   # dec_hi (8,)
            pl.BlockSpec((None, S, TD), lambda b, d: (b, 0, d)),  # x
        ],
        out_specs=out_specs,
        scratch_shapes=[
            pltpu.VMEM((cur_rows, TD), jnp.float32),   # running approx
            pltpu.VMEM((pe_rows, TD), jnp.float32),    # padded even phase
            pltpu.VMEM((pe_rows, TD), jnp.float32),    # padded odd phase
        ],
        compiler_params=pltpu.CompilerParams(
            dimension_semantics=("parallel", "parallel")),
    )(dec_lo, dec_hi, x)
    return outs[0], list(outs[1:])


def linear_interpolate(x, size):
    """torch.nn.functional.interpolate(..., mode='linear', align_corners=False)
    applied along the sequence axis of [B, S, D]."""
    B, lin, D = x.shape
    scale = lin / size
    o = jnp.arange(size, dtype=jnp.float32)
    src = (o + 0.5) * scale - 0.5
    src = jnp.maximum(src, 0.0)
    i0 = jnp.clip(jnp.floor(src).astype(jnp.int32), 0, lin - 1)
    i1 = jnp.minimum(i0 + 1, lin - 1)
    w1 = src - i0.astype(jnp.float32)
    x0 = x[:, i0, :]
    x1 = x[:, i1, :]
    return (1.0 - w1)[None, :, None] * x0 + w1[None, :, None] * x1


def _level_plan(S, levels):
    """Static per-level sizes, mirroring forward_enhanced (incl. the <2 break)."""
    expected_sizes = []
    cur = S
    for _ in range(levels):
        cur = (cur + FILTER_LEN - 1) // 2
        expected_sizes.append(cur)
    level_lens, out_lens = [], []
    cur = S
    for lvl in range(levels):
        level_lens.append(cur)
        out_lens.append(expected_sizes[lvl])
        cur = expected_sizes[lvl]
        if cur < 2:
            break
    return expected_sizes, level_lens, out_lens


def _apply_shape_quirk(approx, details, expected_sizes):
    """_ensure_coefficient_shapes(approx, details, expected_sizes[-1:]): only
    details[0] is compared against the FINAL approx size and, if different,
    linearly interpolated to it; other details pass through."""
    exp_last = expected_sizes[-1]
    corrected = []
    for idx, d in enumerate(details):
        if idx == 0 and d.shape[1] != exp_last:
            corrected.append(linear_interpolate(d, exp_last))
        else:
            corrected.append(d)
    if approx.shape[1] != exp_last:
        approx = linear_interpolate(approx, exp_last)
    return approx, corrected


def enhanced_wavelet_forward_pallas(x, dec_lo, dec_hi, levels=3):
    """EnhancedWaveletTransform.forward for seq_length >= 16 (reflect mode)."""
    B, S, D = x.shape
    if S < 2 ** levels:
        levels = max(1, int(math.log2(S)))
    assert S >= 16, "fft fallback path not implemented"
    # TODO(synk): fft_forward fallback (seq_length < 16, torch.fft + sigmoid
    #             low_pass/high_pass) not ported.

    expected_sizes, level_lens, out_lens = _level_plan(S, levels)
    approx, details = fused_dwt_pallas(x, dec_lo, dec_hi, level_lens, out_lens)
    # NOTE: for mode='reflect' the conv/downsample output length always equals
    # the expected size, so the in-loop pad/trim fix-up in the module is a no-op.
    return _apply_shape_quirk(approx, details, expected_sizes)


# ------------------------- pure-JAX reference path ----------------------------
def _pad_for_level(x):
    """_pad_signal (reflect, 3 each side) followed by the reflect pad inside
    _conv1d_enhanced (left=3, right=4)."""
    pad1 = (FILTER_LEN - 1) // 2
    p1 = jnp.pad(x, ((0, 0), (pad1, pad1), (0, 0)), mode='reflect')
    total = FILTER_LEN - 1
    left = total // 2
    right = total - left
    return jnp.pad(p1, ((0, 0), (left, right), (0, 0)), mode='reflect')


def dwt_level_ref(x, dec_lo, dec_hi):
    B, L, D = x.shape
    p2 = _pad_for_level(x)
    s_out = (L + FILTER_LEN - 1) // 2
    acc_lo = jnp.zeros((B, s_out, D), jnp.float32)
    acc_hi = jnp.zeros((B, s_out, D), jnp.float32)
    for j in range(FILTER_LEN):
        sl = p2[:, j::2, :][:, :s_out, :]
        acc_lo = acc_lo + dec_lo[j] * sl
        acc_hi = acc_hi + dec_hi[j] * sl
    return acc_lo, acc_hi


def _fix_size(t, expected):
    actual = t.shape[1]
    if actual == expected:
        return t
    if actual > expected:
        return t[:, :expected, :]
    return jnp.pad(t, ((0, 0), (0, expected - actual), (0, 0)))


def enhanced_wavelet_forward_ref(x, dec_lo, dec_hi, levels=3):
    B, S, D = x.shape
    if S < 2 ** levels:
        levels = max(1, int(math.log2(S)))
    expected_sizes, _, _ = _level_plan(S, levels)
    details = []
    approx = x
    for level in range(levels):
        a, d = dwt_level_ref(approx, dec_lo, dec_hi)
        a = _fix_size(a, expected_sizes[level])
        d = _fix_size(d, expected_sizes[level])
        details.append(d)
        approx = a
        if approx.shape[1] < 2:
            break
    return _apply_shape_quirk(approx, details, expected_sizes)


# --------------------------------- main ---------------------------------------
if __name__ == "__main__":
    key = jax.random.PRNGKey(0)
    B, S, D = 2, 32, 128   # D multiple of 128 -> lane-dense, unmasked stores
    x = jax.random.normal(key, (B, S, D), dtype=jnp.float32)

    approx, details = enhanced_wavelet_forward_pallas(x, DEC_LO, DEC_HI, levels=3)
    approx = jax.block_until_ready(approx)
    details = [jax.block_until_ready(d) for d in details]

    # Pure-JAX reference (nested jnp.pad reflect + explicit stride-2 conv)
    # cross-checks both the fused in-kernel padding indices and the polyphase conv.
    approx_ref, details_ref = enhanced_wavelet_forward_ref(x, DEC_LO, DEC_HI, levels=3)
    assert approx.shape == approx_ref.shape
    assert np.allclose(np.asarray(approx), np.asarray(approx_ref),
                       atol=1e-5, rtol=1e-5)
    assert len(details) == len(details_ref)
    for d, dr in zip(details, details_ref):
        assert d.shape == dr.shape
        assert np.allclose(np.asarray(d), np.asarray(dr), atol=1e-5, rtol=1e-5)

    print("KERNEL_OK")
</pallas_src>

<mosaic_0001>
module attributes {stable_mosaic.version = 11 : i64} {
  func.func @kernel(%arg0: i32, %arg1: i32, %arg2: memref<8xf32, #tpu.memory_space<smem>>, %arg3: memref<8xf32, #tpu.memory_space<smem>>, %arg4: memref<1x32x128xf32, #tpu.memory_space<vmem>>, %arg5: memref<1x10x128xf32, #tpu.memory_space<vmem>>, %arg6: memref<1x19x128xf32, #tpu.memory_space<vmem>>, %arg7: memref<1x13x128xf32, #tpu.memory_space<vmem>>, %arg8: memref<1x10x128xf32, #tpu.memory_space<vmem>>, %arg9: memref<24x128xf32, #tpu.memory_space<vmem>>, %arg10: memref<24x128xf32, #tpu.memory_space<vmem>>, %arg11: memref<24x128xf32, #tpu.memory_space<vmem>>) attributes {dimension_semantics = [#tpu.dimension_semantics<parallel>, #tpu.dimension_semantics<parallel>], iteration_bounds = array<i64: 2, 1>, scalar_prefetch = 0 : i64, scratch_operands = 3 : i64, tpu.core_type = #tpu.core_type<tc>, window_params = [{transform_indices = @transform_0, window_bounds = array<i64: 8>}, {transform_indices = @transform_1, window_bounds = array<i64: 8>}, {transform_indices = @transform_2, window_bounds = array<i64: 1, 32, 128>}, {transform_indices = @transform_3, window_bounds = array<i64: 1, 10, 128>}, {transform_indices = @transform_4, window_bounds = array<i64: 1, 19, 128>}, {transform_indices = @transform_5, window_bounds = array<i64: 1, 13, 128>}, {transform_indices = @transform_6, window_bounds = array<i64: 1, 10, 128>}]} {
    %c0 = arith.constant 0 : index
    %0 = memref.load %arg2[%c0] : memref<8xf32, #tpu.memory_space<smem>>
    %c1 = arith.constant 1 : index
    %1 = memref.load %arg2[%c1] : memref<8xf32, #tpu.memory_space<smem>>
    %c2 = arith.constant 2 : index
    %2 = memref.load %arg2[%c2] : memref<8xf32, #tpu.memory_space<smem>>
    %c3 = arith.constant 3 : index
    %3 = memref.load %arg2[%c3] : memref<8xf32, #tpu.memory_space<smem>>
    %c4 = arith.constant 4 : index
    %4 = memref.load %arg2[%c4] : memref<8xf32, #tpu.memory_space<smem>>
    %c5 = arith.constant 5 : index
    %5 = memref.load %arg2[%c5] : memref<8xf32, #tpu.memory_space<smem>>
    %c6 = arith.constant 6 : index
    %6 = memref.load %arg2[%c6] : memref<8xf32, #tpu.memory_space<smem>>
    %c7 = arith.constant 7 : index
    %7 = memref.load %arg2[%c7] : memref<8xf32, #tpu.memory_space<smem>>
    %c0_0 = arith.constant 0 : index
    %8 = memref.load %arg3[%c0_0] : memref<8xf32, #tpu.memory_space<smem>>
    %c1_1 = arith.constant 1 : index
    %9 = memref.load %arg3[%c1_1] : memref<8xf32, #tpu.memory_space<smem>>
    %c2_2 = arith.constant 2 : index
    %10 = memref.load %arg3[%c2_2] : memref<8xf32, #tpu.memory_space<smem>>
    %c3_3 = arith.constant 3 : index
    %11 = memref.load %arg3[%c3_3] : memref<8xf32, #tpu.memory_space<smem>>
    %c4_4 = arith.constant 4 : index
    %12 = memref.load %arg3[%c4_4] : memref<8xf32, #tpu.memory_space<smem>>
    %c5_5 = arith.constant 5 : index
    %13 = memref.load %arg3[%c5_5] : memref<8xf32, #tpu.memory_space<smem>>
    %c6_6 = arith.constant 6 : index
    %14 = memref.load %arg3[%c6_6] : memref<8xf32, #tpu.memory_space<smem>>
    %c7_7 = arith.constant 7 : index
    %15 = memref.load %arg3[%c7_7] : memref<8xf32, #tpu.memory_space<smem>>
    %c0_8 = arith.constant 0 : index
    %c0_9 = arith.constant 0 : index
    %c0_10 = arith.constant 0 : index
    %16 = vector.load %arg4[%c0_8, %c0_9, %c0_10] : memref<1x32x128xf32, #tpu.memory_space<vmem>>, vector<1x1x128xf32>
    %17 = vector.shape_cast %16 : vector<1x1x128xf32> to vector<1x128xf32>
    %c0_11 = arith.constant 0 : index
    %c0_12 = arith.constant 0 : index
    %18 = vector.load %arg10[%c0_11, %c0_12] : memref<24x128xf32, #tpu.memory_space<vmem>>, vector<1x128xf32>
    tpu.vector_store %arg10[%c0_11, %c0_12], %17 {strides = array<i32>} : memref<24x128xf32, #tpu.memory_space<vmem>>, vector<1x128xf32>,
    %c0_13 = arith.constant 0 : index
    %c1_14 = arith.constant 1 : index
    %c0_15 = arith.constant 0 : index
    %19 = vector.load %arg4[%c0_13, %c1_14, %c0_15] : memref<1x32x128xf32, #tpu.memory_space<vmem>>, vector<1x1x128xf32>
    %20 = vector.shape_cast %19 : vector<1x1x128xf32> to vector<1x128xf32>
    %c0_16 = arith.constant 0 : index
    %c0_17 = arith.constant 0 : index
    %21 = vector.load %arg11[%c0_16, %c0_17] : memref<24x128xf32, #tpu.memory_space<vmem>>, vector<1x128xf32>
    tpu.vector_store %arg11[%c0_16, %c0_17], %20 {strides = array<i32>} : memref<24x128xf32, #tpu.memory_space<vmem>>, vector<1x128xf32>,
    %c0_18 = arith.constant 0 : index
    %c2_19 = arith.constant 2 : index
    %c0_20 = arith.constant 0 : index
    %22 = vector.load %arg4[%c0_18, %c2_19, %c0_20] : memref<1x32x128xf32, #tpu.memory_space<vmem>>, vector<1x1x128xf32>
    %23 = vector.shape_cast %22 : vector<1x1x128xf32> to vector<1x128xf32>
    %c1_21 = arith.constant 1 : index
    %c0_22 = arith.constant 0 : index
    %24 = vector.load %arg10[%c1_21, %c0_22] : memref<24x128xf32, #tpu.memory_space<vmem>>, vector<1x128xf32>
    tpu.vector_store %arg10[%c1_21, %c0_22], %23 {strides = array<i32>} : memref<24x128xf32, #tpu.memory_space<vmem>>, vector<1x128xf32>,
    %c0_23 = arith.constant 0 : index
    %c3_24 = arith.constant 3 : index
    %c0_25 = arith.constant 0 : index
    %25 = vector.load %arg4[%c0_23, %c3_24, %c0_25] : memref<1x32x128xf32, #tpu.memory_space<vmem>>, vector<1x1x128xf32>
    %26 = vector.shape_cast %25 : vector<1x1x128xf32> to vector<1x128xf32>
    %c1_26 = arith.constant 1 : index
    %c0_27 = arith.constant 0 : index
    %27 = vector.load %arg11[%c1_26, %c0_27] : memref<24x128xf32, #tpu.memory_space<vmem>>, vector<1x128xf32>
    tpu.vector_store %arg11[%c1_26, %c0_27], %26 {strides = array<i32>} : memref<24x128xf32, #tpu.memory_space<vmem>>, vector<1x128xf32>,
    %c0_28 = arith.constant 0 : index
    %c2_29 = arith.constant 2 : index
    %c0_30 = arith.constant 0 : index
    %28 = vector.load %arg4[%c0_28, %c2_29, %c0_30] : memref<1x32x128xf32, #tpu.memory_space<vmem>>, vector<1x1x128xf32>
    %29 = vector.shape_cast %28 : vector<1x1x128xf32> to vector<1x128xf32>
    %c2_31 = arith.constant 2 : index
    %c0_32 = arith.constant 0 : index
    %30 = vector.load %arg10[%c2_31, %c0_32] : memref<24x128xf32, #tpu.memory_space<vmem>>, vector<1x128xf32>
    tpu.vector_store %arg10[%c2_31, %c0_32], %29 {strides = array<i32>} : memref<24x128xf32, #tpu.memory_space<vmem>>, vector<1x128xf32>,
    %c0_33 = arith.constant 0 : index
    %c1_34 = arith.constant 1 : index
    %c0_35 = arith.constant 0 : index
    %31 = vector.load %arg4[%c0_33, %c1_34, %c0_35] : memref<1x32x128xf32, #tpu.memory_space<vmem>>, vector<1x1x128xf32>
    %32 = vector.shape_cast %31 : vector<1x1x128xf32> to vector<1x128xf32>
    %c2_36 = arith.constant 2 : index
    %c0_37 = arith.constant 0 : index
    %33 = vector.load %arg11[%c2_36, %c0_37] : memref<24x128xf32, #tpu.memory_space<vmem>>, vector<1x128xf32>
    tpu.vector_store %arg11[%c2_36, %c0_37], %32 {strides = array<i32>} : memref<24x128xf32, #tpu.memory_space<vmem>>, vector<1x128xf32>,
    %c0_38 = arith.constant 0 : index
    %c0_39 = arith.constant 0 : index
    %c0_40 = arith.constant 0 : index
    %34 = tpu.strided_load %arg4[%c0_38, %c0_39, %c0_40] {strides = array<i32: 1, 2, 1>} : memref<1x32x128xf32, #tpu.memory_space<vmem>>, vector<1x16x128xf32>
    %35 = vector.shape_cast %34 : vector<1x16x128xf32> to vector<16x128xf32>
    %c3_41 = arith.constant 3 : index
    %c0_42 = arith.constant 0 : index
    %36 = vector.load %arg10[%c3_41, %c0_42] : memref<24x128xf32, #tpu.memory_space<vmem>>, vector<16x128xf32>
    tpu.vector_store %arg10[%c3_41, %c0_42], %35 {strides = array<i32>} : memref<24x128xf32, #tpu.memory_space<vmem>>, vector<16x128xf32>,
    %c0_43 = arith.constant 0 : index
    %c1_44 = arith.constant 1 : index
    %c0_45 = arith.constant 0 : index
    %37 = tpu.strided_load %arg4[%c0_43, %c1_44, %c0_45] {strides = array<i32: 1, 2, 1>} : memref<1x32x128xf32, #tpu.memory_space<vmem>>, vector<1x16x128xf32>
    %38 = vector.shape_cast %37 : vector<1x16x128xf32> to vector<16x128xf32>
    %c3_46 = arith.constant 3 : index
    %c0_47 = arith.constant 0 : index
    %39 = vector.load %arg11[%c3_46, %c0_47] : memref<24x128xf32, #tpu.memory_space<vmem>>, vector<16x128xf32>
    tpu.vector_store %arg11[%c3_46, %c0_47], %38 {strides = array<i32>} : memref<24x128xf32, #tpu.memory_space<vmem>>, vector<16x128xf32>,
    %c0_48 = arith.constant 0 : index
    %c30 = arith.constant 30 : index
    %c0_49 = arith.constant 0 : index
    %40 = vector.load %arg4[%c0_48, %c30, %c0_49] : memref<1x32x128xf32, #tpu.memory_space<vmem>>, vector<1x1x128xf32>
    %41 = vector.shape_cast %40 : vector<1x1x128xf32> to vector<1x128xf32>
    %c19 = arith.constant 19 : index
    %c0_50 = arith.constant 0 : index
    %42 = vector.load %arg10[%c19, %c0_50] : memref<24x128xf32, #tpu.memory_space<vmem>>, vector<1x128xf32>
    tpu.vector_store %arg10[%c19, %c0_50], %41 {strides = array<i32>} : memref<24x128xf32, #tpu.memory_space<vmem>>, vector<1x128xf32>,
    %c0_51 = arith.constant 0 : index
    %c29 = arith.constant 29 : index
    %c0_52 = arith.constant 0 : index
    %43 = vector.load %arg4[%c0_51, %c29, %c0_52] : memref<1x32x128xf32, #tpu.memory_space<vmem>>, vector<1x1x128xf32>
    %44 = vector.shape_cast %43 : vector<1x1x128xf32> to vector<1x128xf32>
    %c19_53 = arith.constant 19 : index
    %c0_54 = arith.constant 0 : index
    %45 = vector.load %arg11[%c19_53, %c0_54] : memref<24x128xf32, #tpu.memory_space<vmem>>, vector<1x128xf32>
    tpu.vector_store %arg11[%c19_53, %c0_54], %44 {strides = array<i32>} : memref<24x128xf32, #tpu.memory_space<vmem>>, vector<1x128xf32>,
    %c0_55 = arith.constant 0 : index
    %c28 = arith.constant 28 : index
    %c0_56 = arith.constant 0 : index
    %46 = vector.load %arg4[%c0_55, %c28, %c0_56] : memref<1x32x128xf32, #tpu.memory_space<vmem>>, vector<1x1x128xf32>
    %47 = vector.shape_cast %46 : vector<1x1x128xf32> to vector<1x128xf32>
    %c20 = arith.constant 20 : index
    %c0_57 = arith.constant 0 : index
    %48 = vector.load %arg10[%c20, %c0_57] : memref<24x128xf32, #tpu.memory_space<vmem>>, vector<1x128xf32>
    tpu.vector_store %arg10[%c20, %c0_57], %47 {strides = array<i32>} : memref<24x128xf32, #tpu.memory_space<vmem>>, vector<1x128xf32>,
    %c0_58 = arith.constant 0 : index
    %c29_59 = arith.constant 29 : index
    %c0_60 = arith.constant 0 : index
    %49 = vector.load %arg4[%c0_58, %c29_59, %c0_60] : memref<1x32x128xf32, #tpu.memory_space<vmem>>, vector<1x1x128xf32>
    %50 = vector.shape_cast %49 : vector<1x1x128xf32> to vector<1x128xf32>
    %c20_61 = arith.constant 20 : index
    %c0_62 = arith.constant 0 : index
    %51 = vector.load %arg11[%c20_61, %c0_62] : memref<24x128xf32, #tpu.memory_space<vmem>>, vector<1x128xf32>
    tpu.vector_store %arg11[%c20_61, %c0_62], %50 {strides = array<i32>} : memref<24x128xf32, #tpu.memory_space<vmem>>, vector<1x128xf32>,
    %c0_63 = arith.constant 0 : index
    %c30_64 = arith.constant 30 : index
    %c0_65 = arith.constant 0 : index
    %52 = vector.load %arg4[%c0_63, %c30_64, %c0_65] : memref<1x32x128xf32, #tpu.memory_space<vmem>>, vector<1x1x128xf32>
    %53 = vector.shape_cast %52 : vector<1x1x128xf32> to vector<1x128xf32>
    %c21 = arith.constant 21 : index
    %c0_66 = arith.constant 0 : index
    %54 = vector.load %arg10[%c21, %c0_66] : memref<24x128xf32, #tpu.memory_space<vmem>>, vector<1x128xf32>
    tpu.vector_store %arg10[%c21, %c0_66], %53 {strides = array<i32>} : memref<24x128xf32, #tpu.memory_space<vmem>>, vector<1x128xf32>,
    %c0_67 = arith.constant 0 : index
    %c31 = arith.constant 31 : index
    %c0_68 = arith.constant 0 : index
    %55 = vector.load %arg4[%c0_67, %c31, %c0_68] : memref<1x32x128xf32, #tpu.memory_space<vmem>>, vector<1x1x128xf32>
    %56 = vector.shape_cast %55 : vector<1x1x128xf32> to vector<1x128xf32>
    %c21_69 = arith.constant 21 : index
    %c0_70 = arith.constant 0 : index
    %57 = vector.load %arg11[%c21_69, %c0_70] : memref<24x128xf32, #tpu.memory_space<vmem>>, vector<1x128xf32>
    tpu.vector_store %arg11[%c21_69, %c0_70], %56 {strides = array<i32>} : memref<24x128xf32, #tpu.memory_space<vmem>>, vector<1x128xf32>,
    %c0_71 = arith.constant 0 : index
    %c30_72 = arith.constant 30 : index
    %c0_73 = arith.constant 0 : index
    %58 = vector.load %arg4[%c0_71, %c30_72, %c0_73] : memref<1x32x128xf32, #tpu.memory_space<vmem>>, vector<1x1x128xf32>
    %59 = vector.shape_cast %58 : vector<1x1x128xf32> to vector<1x128xf32>
    %c22 = arith.constant 22 : index
    %c0_74 = arith.constant 0 : index
    %60 = vector.load %arg10[%c22, %c0_74] : memref<24x128xf32, #tpu.memory_space<vmem>>, vector<1x128xf32>
    tpu.vector_store %arg10[%c22, %c0_74], %59 {strides = array<i32>} : memref<24x128xf32, #tpu.memory_space<vmem>>, vector<1x128xf32>,
    %c0_75 = arith.constant 0 : index
    %c0_76 = arith.constant 0 : index
    %61 = vector.load %arg10[%c0_75, %c0_76] : memref<24x128xf32, #tpu.memory_space<vmem>>, vector<19x128xf32>
    %c0_77 = arith.constant 0 : index
    %c0_78 = arith.constant 0 : index
    %62 = vector.load %arg11[%c0_77, %c0_78] : memref<24x128xf32, #tpu.memory_space<vmem>>, vector<19x128xf32>
    %63 = vector.broadcast %0 : f32 to vector<19x128xf32>
    %64 = arith.mulf %63, %61 : vector<19x128xf32>
    %65 = vector.broadcast %1 : f32 to vector<19x128xf32>
    %66 = arith.mulf %65, %62 : vector<19x128xf32>
    %67 = arith.addf %64, %66 : vector<19x128xf32>
    %68 = vector.broadcast %8 : f32 to vector<19x128xf32>
    %69 = arith.mulf %68, %61 : vector<19x128xf32>
    %70 = vector.broadcast %9 : f32 to vector<19x128xf32>
    %71 = arith.mulf %70, %62 : vector<19x128xf32>
    %72 = arith.addf %69, %71 : vector<19x128xf32>
    %c1_79 = arith.constant 1 : index
    %c0_80 = arith.constant 0 : index
    %73 = vector.load %arg10[%c1_79, %c0_80] : memref<24x128xf32, #tpu.memory_space<vmem>>, vector<19x128xf32>
    %c1_81 = arith.constant 1 : index
    %c0_82 = arith.constant 0 : index
    %74 = vector.load %arg11[%c1_81, %c0_82] : memref<24x128xf32, #tpu.memory_space<vmem>>, vector<19x128xf32>
    %75 = vector.broadcast %2 : f32 to vector<19x128xf32>
    %76 = arith.mulf %75, %73 : vector<19x128xf32>
    %77 = vector.broadcast %3 : f32 to vector<19x128xf32>
    %78 = arith.mulf %77, %74 : vector<19x128xf32>
    %79 = arith.addf %76, %78 : vector<19x128xf32>
    %80 = vector.broadcast %10 : f32 to vector<19x128xf32>
    %81 = arith.mulf %80, %73 : vector<19x128xf32>
    %82 = vector.broadcast %11 : f32 to vector<19x128xf32>
    %83 = arith.mulf %82, %74 : vector<19x128xf32>
    %84 = arith.addf %81, %83 : vector<19x128xf32>
    %85 = arith.addf %67, %79 : vector<19x128xf32>
    %86 = arith.addf %72, %84 : vector<19x128xf32>
    %c2_83 = arith.constant 2 : index
    %c0_84 = arith.constant 0 : index
    %87 = vector.load %arg10[%c2_83, %c0_84] : memref<24x128xf32, #tpu.memory_space<vmem>>, vector<19x128xf32>
    %c2_85 = arith.constant 2 : index
    %c0_86 = arith.constant 0 : index
    %88 = vector.load %arg11[%c2_85, %c0_86] : memref<24x128xf32, #tpu.memory_space<vmem>>, vector<19x128xf32>
    %89 = vector.broadcast %4 : f32 to vector<19x128xf32>
    %90 = arith.mulf %89, %87 : vector<19x128xf32>
    %91 = vector.broadcast %5 : f32 to vector<19x128xf32>
    %92 = arith.mulf %91, %88 : vector<19x128xf32>
    %93 = arith.addf %90, %92 : vector<19x128xf32>
    %94 = vector.broadcast %12 : f32 to vector<19x128xf32>
    %95 = arith.mulf %94, %87 : vector<19x128xf32>
    %96 = vector.broadcast %13 : f32 to vector<19x128xf32>
    %97 = arith.mulf %96, %88 : vector<19x128xf32>
    %98 = arith.addf %95, %97 : vector<19x128xf32>
    %99 = arith.addf %85, %93 : vector<19x128xf32>
    %100 = arith.addf %86, %98 : vector<19x128xf32>
    %c3_87 = arith.constant 3 : index
    %c0_88 = arith.constant 0 : index
    %101 = vector.load %arg10[%c3_87, %c0_88] : memref<24x128xf32, #tpu.memory_space<vmem>>, vector<19x128xf32>
    %c3_89 = arith.constant 3 : index
    %c0_90 = arith.constant 0 : index
    %102 = vector.load %arg11[%c3_89, %c0_90] : memref<24x128xf32, #tpu.memory_space<vmem>>, vector<19x128xf32>
    %103 = vector.broadcast %6 : f32 to vector<19x128xf32>
    %104 = arith.mulf %103, %101 : vector<19x128xf32>
    %105 = vector.broadcast %7 : f32 to vector<19x128xf32>
    %106 = arith.mulf %105, %102 : vector<19x128xf32>
    %107 = arith.addf %104, %106 : vector<19x128xf32>
    %108 = vector.broadcast %14 : f32 to vector<19x128xf32>
    %109 = arith.mulf %108, %101 : vector<19x128xf32>
    %110 = vector.broadcast %15 : f32 to vector<19x128xf32>
    %111 = arith.mulf %110, %102 : vector<19x128xf32>
    %112 = arith.addf %109, %111 : vector<19x128xf32>
    %113 = arith.addf %99, %107 : vector<19x128xf32>
    %114 = arith.addf %100, %112 : vector<19x128xf32>
    %c0_91 = arith.constant 0 : index
    %c0_92 = arith.constant 0 : index
    %c0_93 = arith.constant 0 : index
    %115 = vector.load %arg6[%c0_91, %c0_92, %c0_93] : memref<1x19x128xf32, #tpu.memory_space<vmem>>, vector<1x19x128xf32>
    %116 = vector.shape_cast %115 : vector<1x19x128xf32> to vector<19x128xf32>
    %117 = vector.shape_cast %114 : vector<19x128xf32> to vector<1x19x128xf32>
    tpu.vector_store %arg6[%c0_91, %c0_92, %c0_93], %117 {strides = array<i32>} : memref<1x19x128xf32, #tpu.memory_space<vmem>>, vector<1x19x128xf32>,
    %c0_94 = arith.constant 0 : index
    %c0_95 = arith.constant 0 : index
    %118 = vector.load %arg9[%c0_94, %c0_95] : memref<24x128xf32, #tpu.memory_space<vmem>>, vector<19x128xf32>
    tpu.vector_store %arg9[%c0_94, %c0_95], %113 {strides = array<i32>} : memref<24x128xf32, #tpu.memory_space<vmem>>, vector<19x128xf32>,
    %c0_96 = arith.constant 0 : index
    %c0_97 = arith.constant 0 : index
    %119 = vector.load %arg9[%c0_96, %c0_97] : memref<24x128xf32, #tpu.memory_space<vmem>>, vector<1x128xf32>
    %c0_98 = arith.constant 0 : index
    %c0_99 = arith.constant 0 : index
    %120 = vector.load %arg10[%c0_98, %c0_99] : memref<24x128xf32, #tpu.memory_space<vmem>>, vector<1x128xf32>
    tpu.vector_store %arg10[%c0_98, %c0_99], %119 {strides = array<i32>} : memref<24x128xf32, #tpu.memory_space<vmem>>, vector<1x128xf32>,
    %c1_100 = arith.constant 1 : index
    %c0_101 = arith.constant 0 : index
    %121 = vector.load %arg9[%c1_100, %c0_101] : memref<24x128xf32, #tpu.memory_space<vmem>>, vector<1x128xf32>
    %c0_102 = arith.constant 0 : index
    %c0_103 = arith.constant 0 : index
    %122 = vector.load %arg11[%c0_102, %c0_103] : memref<24x128xf32, #tpu.memory_space<vmem>>, vector<1x128xf32>
    tpu.vector_store %arg11[%c0_102, %c0_103], %121 {strides = array<i32>} : memref<24x128xf32, #tpu.memory_space<vmem>>, vector<1x128xf32>,
    %c2_104 = arith.constant 2 : index
    %c0_105 = arith.constant 0 : index
    %123 = vector.load %arg9[%c2_104, %c0_105] : memref<24x128xf32, #tpu.memory_space<vmem>>, vector<1x128xf32>
    %c1_106 = arith.constant 1 : index
    %c0_107 = arith.constant 0 : index
    %124 = vector.load %arg10[%c1_106, %c0_107] : memref<24x128xf32, #tpu.memory_space<vmem>>, vector<1x128xf32>
    tpu.vector_store %arg10[%c1_106, %c0_107], %123 {strides = array<i32>} : memref<24x128xf32, #tpu.memory_space<vmem>>, vector<1x128xf32>,
    %c3_108 = arith.constant 3 : index
    %c0_109 = arith.constant 0 : index
    %125 = vector.load %arg9[%c3_108, %c0_109] : memref<24x128xf32, #tpu.memory_space<vmem>>, vector<1x128xf32>
    %c1_110 = arith.constant 1 : index
    %c0_111 = arith.constant 0 : index
    %126 = vector.load %arg11[%c1_110, %c0_111] : memref<24x128xf32, #tpu.memory_space<vmem>>, vector<1x128xf32>
    tpu.vector_store %arg11[%c1_110, %c0_111], %125 {strides = array<i32>} : memref<24x128xf32, #tpu.memory_space<vmem>>, vector<1x128xf32>,
    %c2_112 = arith.constant 2 : index
    %c0_113 = arith.constant 0 : index
    %127 = vector.load %arg9[%c2_112, %c0_113] : memref<24x128xf32, #tpu.memory_space<vmem>>, vector<1x128xf32>
    %c2_114 = arith.constant 2 : index
    %c0_115 = arith.constant 0 : index
    %128 = vector.load %arg10[%c2_114, %c0_115] : memref<24x128xf32, #tpu.memory_space<vmem>>, vector<1x128xf32>
    tpu.vector_store %arg10[%c2_114, %c0_115], %127 {strides = array<i32>} : memref<24x128xf32, #tpu.memory_space<vmem>>, vector<1x128xf32>,
    %c1_116 = arith.constant 1 : index
    %c0_117 = arith.constant 0 : index
    %129 = vector.load %arg9[%c1_116, %c0_117] : memref<24x128xf32, #tpu.memory_space<vmem>>, vector<1x128xf32>
    %c2_118 = arith.constant 2 : index
    %c0_119 = arith.constant 0 : index
    %130 = vector.load %arg11[%c2_118, %c0_119] : memref<24x128xf32, #tpu.memory_space<vmem>>, vector<1x128xf32>
    tpu.vector_store %arg11[%c2_118, %c0_119], %129 {strides = array<i32>} : memref<24x128xf32, #tpu.memory_space<vmem>>, vector<1x128xf32>,
    %c0_120 = arith.constant 0 : index
    %c0_121 = arith.constant 0 : index
    %131 = tpu.strided_load %arg9[%c0_120, %c0_121] {strides = array<i32: 2, 1>} : memref<24x128xf32, #tpu.memory_space<vmem>>, vector<10x128xf32>
    %c3_122 = arith.constant 3 : index
    %c0_123 = arith.constant 0 : index
    %132 = vector.load %arg10[%c3_122, %c0_123] : memref<24x128xf32, #tpu.memory_space<vmem>>, vector<10x128xf32>
    tpu.vector_store %arg10[%c3_122, %c0_123], %131 {strides = array<i32>} : memref<24x128xf32, #tpu.memory_space<vmem>>, vector<10x128xf32>,
    %c1_124 = arith.constant 1 : index
    %c0_125 = arith.constant 0 : index
    %133 = tpu.strided_load %arg9[%c1_124, %c0_125] {strides = array<i32: 2, 1>} : memref<24x128xf32, #tpu.memory_space<vmem>>, vector<9x128xf32>
    %c3_126 = arith.constant 3 : index
    %c0_127 = arith.constant 0 : index
    %134 = vector.load %arg11[%c3_126, %c0_127] : memref<24x128xf32, #tpu.memory_space<vmem>>, vector<9x128xf32>
    tpu.vector_store %arg11[%c3_126, %c0_127], %133 {strides = array<i32>} : memref<24x128xf32, #tpu.memory_space<vmem>>, vector<9x128xf32>,
    %c17 = arith.constant 17 : index
    %c0_128 = arith.constant 0 : index
    %135 = vector.load %arg9[%c17, %c0_128] : memref<24x128xf32, #tpu.memory_space<vmem>>, vector<1x128xf32>
    %c12 = arith.constant 12 : index
    %c0_129 = arith.constant 0 : index
    %136 = vector.load %arg11[%c12, %c0_129] : memref<24x128xf32, #tpu.memory_space<vmem>>, vector<1x128xf32>
    tpu.vector_store %arg11[%c12, %c0_129], %135 {strides = array<i32>} : memref<24x128xf32, #tpu.memory_space<vmem>>, vector<1x128xf32>,
    %c16 = arith.constant 16 : index
    %c0_130 = arith.constant 0 : index
    %137 = vector.load %arg9[%c16, %c0_130] : memref<24x128xf32, #tpu.memory_space<vmem>>, vector<1x128xf32>
    %c13 = arith.constant 13 : index
    %c0_131 = arith.constant 0 : index
    %138 = vector.load %arg10[%c13, %c0_131] : memref<24x128xf32, #tpu.memory_space<vmem>>, vector<1x128xf32>
    tpu.vector_store %arg10[%c13, %c0_131], %137 {strides = array<i32>} : memref<24x128xf32, #tpu.memory_space<vmem>>, vector<1x128xf32>,
    %c15 = arith.constant 15 : index
    %c0_132 = arith.constant 0 : index
    %139 = vector.load %arg9[%c15, %c0_132] : memref<24x128xf32, #tpu.memory_space<vmem>>, vector<1x128xf32>
    %c13_133 = arith.constant 13 : index
    %c0_134 = arith.constant 0 : index
    %140 = vector.load %arg11[%c13_133, %c0_134] : memref<24x128xf32, #tpu.memory_space<vmem>>, vector<1x128xf32>
    tpu.vector_store %arg11[%c13_133, %c0_134], %139 {strides = array<i32>} : memref<24x128xf32, #tpu.memory_space<vmem>>, vector<1x128xf32>,
    %c16_135 = arith.constant 16 : index
    %c0_136 = arith.constant 0 : index
    %141 = vector.load %arg9[%c16_135, %c0_136] : memref<24x128xf32, #tpu.memory_space<vmem>>, vector<1x128xf32>
    %c14 = arith.constant 14 : index
    %c0_137 = arith.constant 0 : index
    %142 = vector.load %arg10[%c14, %c0_137] : memref<24x128xf32, #tpu.memory_space<vmem>>, vector<1x128xf32>
    tpu.vector_store %arg10[%c14, %c0_137], %141 {strides = array<i32>} : memref<24x128xf32, #tpu.memory_space<vmem>>, vector<1x128xf32>,
    %c17_138 = arith.constant 17 : index
    %c0_139 = arith.constant 0 : index
    %143 = vector.load %arg9[%c17_138, %c0_139] : memref<24x128xf32, #tpu.memory_space<vmem>>, vector<1x128xf32>
    %c14_140 = arith.constant 14 : index
    %c0_141 = arith.constant 0 : index
    %144 = vector.load %arg11[%c14_140, %c0_141] : memref<24x128xf32, #tpu.memory_space<vmem>>, vector<1x128xf32>
    tpu.vector_store %arg11[%c14_140, %c0_141], %143 {strides = array<i32>} : memref<24x128xf32, #tpu.memory_space<vmem>>, vector<1x128xf32>,
    %c18 = arith.constant 18 : index
    %c0_142 = arith.constant 0 : index
    %145 = vector.load %arg9[%c18, %c0_142] : memref<24x128xf32, #tpu.memory_space<vmem>>, vector<1x128xf32>
    %c15_143 = arith.constant 15 : index
    %c0_144 = arith.constant 0 : index
    %146 = vector.load %arg10[%c15_143, %c0_144] : memref<24x128xf32, #tpu.memory_space<vmem>>, vector<1x128xf32>
    tpu.vector_store %arg10[%c15_143, %c0_144], %145 {strides = array<i32>} : memref<24x128xf32, #tpu.memory_space<vmem>>, vector<1x128xf32>,
    %c17_145 = arith.constant 17 : index
    %c0_146 = arith.constant 0 : index
    %147 = vector.load %arg9[%c17_145, %c0_146] : memref<24x128xf32, #tpu.memory_space<vmem>>, vector<1x128xf32>
    %c15_147 = arith.constant 15 : index
    %c0_148 = arith.constant 0 : index
    %148 = vector.load %arg11[%c15_147, %c0_148] : memref<24x128xf32, #tpu.memory_space<vmem>>, vector<1x128xf32>
    tpu.vector_store %arg11[%c15_147, %c0_148], %147 {strides = array<i32>} : memref<24x128xf32, #tpu.memory_space<vmem>>, vector<1x128xf32>,
    %c0_149 = arith.constant 0 : index
    %c0_150 = arith.constant 0 : index
    %149 = vector.load %arg10[%c0_149, %c0_150] : memref<24x128xf32, #tpu.memory_space<vmem>>, vector<13x128xf32>
    %c0_151 = arith.constant 0 : index
    %c0_152 = arith.constant 0 : index
    %150 = vector.load %arg11[%c0_151, %c0_152] : memref<24x128xf32, #tpu.memory_space<vmem>>, vector<13x128xf32>
    %151 = vector.broadcast %0 : f32 to vector<13x128xf32>
    %152 = arith.mulf %151, %149 : vector<13x128xf32>
    %153 = vector.broadcast %1 : f32 to vector<13x128xf32>
    %154 = arith.mulf %153, %150 : vector<13x128xf32>
    %155 = arith.addf %152, %154 : vector<13x128xf32>
    %156 = vector.broadcast %8 : f32 to vector<13x128xf32>
    %157 = arith.mulf %156, %149 : vector<13x128xf32>
    %158 = vector.broadcast %9 : f32 to vector<13x128xf32>
    %159 = arith.mulf %158, %150 : vector<13x128xf32>
    %160 = arith.addf %157, %159 : vector<13x128xf32>
    %c1_153 = arith.constant 1 : index
    %c0_154 = arith.constant 0 : index
    %161 = vector.load %arg10[%c1_153, %c0_154] : memref<24x128xf32, #tpu.memory_space<vmem>>, vector<13x128xf32>
    %c1_155 = arith.constant 1 : index
    %c0_156 = arith.constant 0 : index
    %162 = vector.load %arg11[%c1_155, %c0_156] : memref<24x128xf32, #tpu.memory_space<vmem>>, vector<13x128xf32>
    %163 = vector.broadcast %2 : f32 to vector<13x128xf32>
    %164 = arith.mulf %163, %161 : vector<13x128xf32>
    %165 = vector.broadcast %3 : f32 to vector<13x128xf32>
    %166 = arith.mulf %165, %162 : vector<13x128xf32>
    %167 = arith.addf %164, %166 : vector<13x128xf32>
    %168 = vector.broadcast %10 : f32 to vector<13x128xf32>
    %169 = arith.mulf %168, %161 : vector<13x128xf32>
    %170 = vector.broadcast %11 : f32 to vector<13x128xf32>
    %171 = arith.mulf %170, %162 : vector<13x128xf32>
    %172 = arith.addf %169, %171 : vector<13x128xf32>
    %173 = arith.addf %155, %167 : vector<13x128xf32>
    %174 = arith.addf %160, %172 : vector<13x128xf32>
    %c2_157 = arith.constant 2 : index
    %c0_158 = arith.constant 0 : index
    %175 = vector.load %arg10[%c2_157, %c0_158] : memref<24x128xf32, #tpu.memory_space<vmem>>, vector<13x128xf32>
    %c2_159 = arith.constant 2 : index
    %c0_160 = arith.constant 0 : index
    %176 = vector.load %arg11[%c2_159, %c0_160] : memref<24x128xf32, #tpu.memory_space<vmem>>, vector<13x128xf32>
    %177 = vector.broadcast %4 : f32 to vector<13x128xf32>
    %178 = arith.mulf %177, %175 : vector<13x128xf32>
    %179 = vector.broadcast %5 : f32 to vector<13x128xf32>
    %180 = arith.mulf %179, %176 : vector<13x128xf32>
    %181 = arith.addf %178, %180 : vector<13x128xf32>
    %182 = vector.broadcast %12 : f32 to vector<13x128xf32>
    %183 = arith.mulf %182, %175 : vector<13x128xf32>
    %184 = vector.broadcast %13 : f32 to vector<13x128xf32>
    %185 = arith.mulf %184, %176 : vector<13x128xf32>
    %186 = arith.addf %183, %185 : vector<13x128xf32>
    %187 = arith.addf %173, %181 : vector<13x128xf32>
    %188 = arith.addf %174, %186 : vector<13x128xf32>
    %c3_161 = arith.constant 3 : index
    %c0_162 = arith.constant 0 : index
    %189 = vector.load %arg10[%c3_161, %c0_162] : memref<24x128xf32, #tpu.memory_space<vmem>>, vector<13x128xf32>
    %c3_163 = arith.constant 3 : index
    %c0_164 = arith.constant 0 : index
    %190 = vector.load %arg11[%c3_163, %c0_164] : memref<24x128xf32, #tpu.memory_space<vmem>>, vector<13x128xf32>
    %191 = vector.broadcast %6 : f32 to vector<13x128xf32>
    %192 = arith.mulf %191, %189 : vector<13x128xf32>
    %193 = vector.broadcast %7 : f32 to vector<13x128xf32>
    %194 = arith.mulf %193, %190 : vector<13x128xf32>
    %195 = arith.addf %192, %194 : vector<13x128xf32>
    %196 = vector.broadcast %14 : f32 to vector<13x128xf32>
    %197 = arith.mulf %196, %189 : vector<13x128xf32>
    %198 = vector.broadcast %15 : f32 to vector<13x128xf32>
    %199 = arith.mulf %198, %190 : vector<13x128xf32>
    %200 = arith.addf %197, %199 : vector<13x128xf32>
    %201 = arith.addf %187, %195 : vector<13x128xf32>
    %202 = arith.addf %188, %200 : vector<13x128xf32>
    %c0_165 = arith.constant 0 : index
    %c0_166 = arith.constant 0 : index
    %c0_167 = arith.constant 0 : index
    %203 = vector.load %arg7[%c0_165, %c0_166, %c0_167] : memref<1x13x128xf32, #tpu.memory_space<vmem>>, vector<1x13x128xf32>
    %204 = vector.shape_cast %203 : vector<1x13x128xf32> to vector<13x128xf32>
    %205 = vector.shape_cast %202 : vector<13x128xf32> to vector<1x13x128xf32>
    tpu.vector_store %arg7[%c0_165, %c0_166, %c0_167], %205 {strides = array<i32>} : memref<1x13x128xf32, #tpu.memory_space<vmem>>, vector<1x13x128xf32>,
    %c0_168 = arith.constant 0 : index
    %c0_169 = arith.constant 0 : index
    %206 = vector.load %arg9[%c0_168, %c0_169] : memref<24x128xf32, #tpu.memory_space<vmem>>, vector<13x128xf32>
    tpu.vector_store %arg9[%c0_168, %c0_169], %201 {strides = array<i32>} : memref<24x128xf32, #tpu.memory_space<vmem>>, vector<13x128xf32>,
    %c0_170 = arith.constant 0 : index
    %c0_171 = arith.constant 0 : index
    %207 = vector.load %arg9[%c0_170, %c0_171] : memref<24x128xf32, #tpu.memory_space<vmem>>, vector<1x128xf32>
    %c0_172 = arith.constant 0 : index
    %c0_173 = arith.constant 0 : index
    %208 = vector.load %arg10[%c0_172, %c0_173] : memref<24x128xf32, #tpu.memory_space<vmem>>, vector<1x128xf32>
    tpu.vector_store %arg10[%c0_172, %c0_173], %207 {strides = array<i32>} : memref<24x128xf32, #tpu.memory_space<vmem>>, vector<1x128xf32>,
    %c1_174 = arith.constant 1 : index
    %c0_175 = arith.constant 0 : index
    %209 = vector.load %arg9[%c1_174, %c0_175] : memref<24x128xf32, #tpu.memory_space<vmem>>, vector<1x128xf32>
    %c0_176 = arith.constant 0 : index
    %c0_177 = arith.constant 0 : index
    %210 = vector.load %arg11[%c0_176, %c0_177] : memref<24x128xf32, #tpu.memory_space<vmem>>, vector<1x128xf32>
    tpu.vector_store %arg11[%c0_176, %c0_177], %209 {strides = array<i32>} : memref<24x128xf32, #tpu.memory_space<vmem>>, vector<1x128xf32>,
    %c2_178 = arith.constant 2 : index
    %c0_179 = arith.constant 0 : index
    %211 = vector.load %arg9[%c2_178, %c0_179] : memref<24x128xf32, #tpu.memory_space<vmem>>, vector<1x128xf32>
    %c1_180 = arith.constant 1 : index
    %c0_181 = arith.constant 0 : index
    %212 = vector.load %arg10[%c1_180, %c0_181] : memref<24x128xf32, #tpu.memory_space<vmem>>, vector<1x128xf32>
    tpu.vector_store %arg10[%c1_180, %c0_181], %211 {strides = array<i32>} : memref<24x128xf32, #tpu.memory_space<vmem>>, vector<1x128xf32>,
    %c3_182 = arith.constant 3 : index
    %c0_183 = arith.constant 0 : index
    %213 = vector.load %arg9[%c3_182, %c0_183] : memref<24x128xf32, #tpu.memory_space<vmem>>, vector<1x128xf32>
    %c1_184 = arith.constant 1 : index
    %c0_185 = arith.constant 0 : index
    %214 = vector.load %arg11[%c1_184, %c0_185] : memref<24x128xf32, #tpu.memory_space<vmem>>, vector<1x128xf32>
    tpu.vector_store %arg11[%c1_184, %c0_185], %213 {strides = array<i32>} : memref<24x128xf32, #tpu.memory_space<vmem>>, vector<1x128xf32>,
    %c2_186 = arith.constant 2 : index
    %c0_187 = arith.constant 0 : index
    %215 = vector.load %arg9[%c2_186, %c0_187] : memref<24x128xf32, #tpu.memory_space<vmem>>, vector<1x128xf32>
    %c2_188 = arith.constant 2 : index
    %c0_189 = arith.constant 0 : index
    %216 = vector.load %arg10[%c2_188, %c0_189] : memref<24x128xf32, #tpu.memory_space<vmem>>, vector<1x128xf32>
    tpu.vector_store %arg10[%c2_188, %c0_189], %215 {strides = array<i32>} : memref<24x128xf32, #tpu.memory_space<vmem>>, vector<1x128xf32>,
    %c1_190 = arith.constant 1 : index
    %c0_191 = arith.constant 0 : index
    %217 = vector.load %arg9[%c1_190, %c0_191] : memref<24x128xf32, #tpu.memory_space<vmem>>, vector<1x128xf32>
    %c2_192 = arith.constant 2 : index
    %c0_193 = arith.constant 0 : index
    %218 = vector.load %arg11[%c2_192, %c0_193] : memref<24x128xf32, #tpu.memory_space<vmem>>, vector<1x128xf32>
    tpu.vector_store %arg11[%c2_192, %c0_193], %217 {strides = array<i32>} : memref<24x128xf32, #tpu.memory_space<vmem>>, vector<1x128xf32>,
    %c0_194 = arith.constant 0 : index
    %c0_195 = arith.constant 0 : index
    %219 = tpu.strided_load %arg9[%c0_194, %c0_195] {strides = array<i32: 2, 1>} : memref<24x128xf32, #tpu.memory_space<vmem>>, vector<7x128xf32>
    %c3_196 = arith.constant 3 : index
    %c0_197 = arith.constant 0 : index
    %220 = vector.load %arg10[%c3_196, %c0_197] : memref<24x128xf32, #tpu.memory_space<vmem>>, vector<7x128xf32>
    tpu.vector_store %arg10[%c3_196, %c0_197], %219 {strides = array<i32>} : memref<24x128xf32, #tpu.memory_space<vmem>>, vector<7x128xf32>,
    %c1_198 = arith.constant 1 : index
    %c0_199 = arith.constant 0 : index
    %221 = tpu.strided_load %arg9[%c1_198, %c0_199] {strides = array<i32: 2, 1>} : memref<24x128xf32, #tpu.memory_space<vmem>>, vector<6x128xf32>
    %c3_200 = arith.constant 3 : index
    %c0_201 = arith.constant 0 : index
    %222 = vector.load %arg11[%c3_200, %c0_201] : memref<24x128xf32, #tpu.memory_space<vmem>>, vector<6x128xf32>
    tpu.vector_store %arg11[%c3_200, %c0_201], %221 {strides = array<i32>} : memref<24x128xf32, #tpu.memory_space<vmem>>, vector<6x128xf32>,
    %c11 = arith.constant 11 : index
    %c0_202 = arith.constant 0 : index
    %223 = vector.load %arg9[%c11, %c0_202] : memref<24x128xf32, #tpu.memory_space<vmem>>, vector<1x128xf32>
    %c9 = arith.constant 9 : index
    %c0_203 = arith.constant 0 : index
    %224 = vector.load %arg11[%c9, %c0_203] : memref<24x128xf32, #tpu.memory_space<vmem>>, vector<1x128xf32>
    tpu.vector_store %arg11[%c9, %c0_203], %223 {strides = array<i32>} : memref<24x128xf32, #tpu.memory_space<vmem>>, vector<1x128xf32>,
    %c10 = arith.constant 10 : index
    %c0_204 = arith.constant 0 : index
    %225 = vector.load %arg9[%c10, %c0_204] : memref<24x128xf32, #tpu.memory_space<vmem>>, vector<1x128xf32>
    %c10_205 = arith.constant 10 : index
    %c0_206 = arith.constant 0 : index
    %226 = vector.load %arg10[%c10_205, %c0_206] : memref<24x128xf32, #tpu.memory_space<vmem>>, vector<1x128xf32>
    tpu.vector_store %arg10[%c10_205, %c0_206], %225 {strides = array<i32>} : memref<24x128xf32, #tpu.memory_space<vmem>>, vector<1x128xf32>,
    %c9_207 = arith.constant 9 : index
    %c0_208 = arith.constant 0 : index
    %227 = vector.load %arg9[%c9_207, %c0_208] : memref<24x128xf32, #tpu.memory_space<vmem>>, vector<1x128xf32>
    %c10_209 = arith.constant 10 : index
    %c0_210 = arith.constant 0 : index
    %228 = vector.load %arg11[%c10_209, %c0_210] : memref<24x128xf32, #tpu.memory_space<vmem>>, vector<1x128xf32>
    tpu.vector_store %arg11[%c10_209, %c0_210], %227 {strides = array<i32>} : memref<24x128xf32, #tpu.memory_space<vmem>>, vector<1x128xf32>,
    %c10_211 = arith.constant 10 : index
    %c0_212 = arith.constant 0 : index
    %229 = vector.load %arg9[%c10_211, %c0_212] : memref<24x128xf32, #tpu.memory_space<vmem>>, vector<1x128xf32>
    %c11_213 = arith.constant 11 : index
    %c0_214 = arith.constant 0 : index
    %230 = vector.load %arg10[%c11_213, %c0_214] : memref<24x128xf32, #tpu.memory_space<vmem>>, vector<1x128xf32>
    tpu.vector_store %arg10[%c11_213, %c0_214], %229 {strides = array<i32>} : memref<24x128xf32, #tpu.memory_space<vmem>>, vector<1x128xf32>,
    %c11_215 = arith.constant 11 : index
    %c0_216 = arith.constant 0 : index
    %231 = vector.load %arg9[%c11_215, %c0_216] : memref<24x128xf32, #tpu.memory_space<vmem>>, vector<1x128xf32>
    %c11_217 = arith.constant 11 : index
    %c0_218 = arith.constant 0 : index
    %232 = vector.load %arg11[%c11_217, %c0_218] : memref<24x128xf32, #tpu.memory_space<vmem>>, vector<1x128xf32>
    tpu.vector_store %arg11[%c11_217, %c0_218], %231 {strides = array<i32>} : memref<24x128xf32, #tpu.memory_space<vmem>>, vector<1x128xf32>,
    %c12_219 = arith.constant 12 : index
    %c0_220 = arith.constant 0 : index
    %233 = vector.load %arg9[%c12_219, %c0_220] : memref<24x128xf32, #tpu.memory_space<vmem>>, vector<1x128xf32>
    %c12_221 = arith.constant 12 : index
    %c0_222 = arith.constant 0 : index
    %234 = vector.load %arg10[%c12_221, %c0_222] : memref<24x128xf32, #tpu.memory_space<vmem>>, vector<1x128xf32>
    tpu.vector_store %arg10[%c12_221, %c0_222], %233 {strides = array<i32>} : memref<24x128xf32, #tpu.memory_space<vmem>>, vector<1x128xf32>,
    %c11_223 = arith.constant 11 : index
    %c0_224 = arith.constant 0 : index
    %235 = vector.load %arg9[%c11_223, %c0_224] : memref<24x128xf32, #tpu.memory_space<vmem>>, vector<1x128xf32>
    %c12_225 = arith.constant 12 : index
    %c0_226 = arith.constant 0 : index
    %236 = vector.load %arg11[%c12_225, %c0_226] : memref<24x128xf32, #tpu.memory_space<vmem>>, vector<1x128xf32>
    tpu.vector_store %arg11[%c12_225, %c0_226], %235 {strides = array<i32>} : memref<24x128xf32, #tpu.memory_space<vmem>>, vector<1x128xf32>,
    %c0_227 = arith.constant 0 : index
    %c0_228 = arith.constant 0 : index
    %237 = vector.load %arg10[%c0_227, %c0_228] : memref<24x128xf32, #tpu.memory_space<vmem>>, vector<10x128xf32>
    %c0_229 = arith.constant 0 : index
    %c0_230 = arith.constant 0 : index
    %238 = vector.load %arg11[%c0_229, %c0_230] : memref<24x128xf32, #tpu.memory_space<vmem>>, vector<10x128xf32>
    %239 = vector.broadcast %0 : f32 to vector<10x128xf32>
    %240 = arith.mulf %239, %237 : vector<10x128xf32>
    %241 = vector.broadcast %1 : f32 to vector<10x128xf32>
    %242 = arith.mulf %241, %238 : vector<10x128xf32>
    %243 = arith.addf %240, %242 : vector<10x128xf32>
    %244 = vector.broadcast %8 : f32 to vector<10x128xf32>
    %245 = arith.mulf %244, %237 : vector<10x128xf32>
    %246 = vector.broadcast %9 : f32 to vector<10x128xf32>
    %247 = arith.mulf %246, %238 : vector<10x128xf32>
    %248 = arith.addf %245, %247 : vector<10x128xf32>
    %c1_231 = arith.constant 1 : index
    %c0_232 = arith.constant 0 : index
    %249 = vector.load %arg10[%c1_231, %c0_232] : memref<24x128xf32, #tpu.memory_space<vmem>>, vector<10x128xf32>
    %c1_233 = arith.constant 1 : index
    %c0_234 = arith.constant 0 : index
    %250 = vector.load %arg11[%c1_233, %c0_234] : memref<24x128xf32, #tpu.memory_space<vmem>>, vector<10x128xf32>
    %251 = vector.broadcast %2 : f32 to vector<10x128xf32>
    %252 = arith.mulf %251, %249 : vector<10x128xf32>
    %253 = vector.broadcast %3 : f32 to vector<10x128xf32>
    %254 = arith.mulf %253, %250 : vector<10x128xf32>
    %255 = arith.addf %252, %254 : vector<10x128xf32>
    %256 = vector.broadcast %10 : f32 to vector<10x128xf32>
    %257 = arith.mulf %256, %249 : vector<10x128xf32>
    %258 = vector.broadcast %11 : f32 to vector<10x128xf32>
    %259 = arith.mulf %258, %250 : vector<10x128xf32>
    %260 = arith.addf %257, %259 : vector<10x128xf32>
    %261 = arith.addf %243, %255 : vector<10x128xf32>
    %262 = arith.addf %248, %260 : vector<10x128xf32>
    %c2_235 = arith.constant 2 : index
    %c0_236 = arith.constant 0 : index
    %263 = vector.load %arg10[%c2_235, %c0_236] : memref<24x128xf32, #tpu.memory_space<vmem>>, vector<10x128xf32>
    %c2_237 = arith.constant 2 : index
    %c0_238 = arith.constant 0 : index
    %264 = vector.load %arg11[%c2_237, %c0_238] : memref<24x128xf32, #tpu.memory_space<vmem>>, vector<10x128xf32>
    %265 = vector.broadcast %4 : f32 to vector<10x128xf32>
    %266 = arith.mulf %265, %263 : vector<10x128xf32>
    %267 = vector.broadcast %5 : f32 to vector<10x128xf32>
    %268 = arith.mulf %267, %264 : vector<10x128xf32>
    %269 = arith.addf %266, %268 : vector<10x128xf32>
    %270 = vector.broadcast %12 : f32 to vector<10x128xf32>
    %271 = arith.mulf %270, %263 : vector<10x128xf32>
    %272 = vector.broadcast %13 : f32 to vector<10x128xf32>
    %273 = arith.mulf %272, %264 : vector<10x128xf32>
    %274 = arith.addf %271, %273 : vector<10x128xf32>
    %275 = arith.addf %261, %269 : vector<10x128xf32>
    %276 = arith.addf %262, %274 : vector<10x128xf32>
    %c3_239 = arith.constant 3 : index
    %c0_240 = arith.constant 0 : index
    %277 = vector.load %arg10[%c3_239, %c0_240] : memref<24x128xf32, #tpu.memory_space<vmem>>, vector<10x128xf32>
    %c3_241 = arith.constant 3 : index
    %c0_242 = arith.constant 0 : index
    %278 = vector.load %arg11[%c3_241, %c0_242] : memref<24x128xf32, #tpu.memory_space<vmem>>, vector<10x128xf32>
    %279 = vector.broadcast %6 : f32 to vector<10x128xf32>
    %280 = arith.mulf %279, %277 : vector<10x128xf32>
    %281 = vector.broadcast %7 : f32 to vector<10x128xf32>
    %282 = arith.mulf %281, %278 : vector<10x128xf32>
    %283 = arith.addf %280, %282 : vector<10x128xf32>
    %284 = vector.broadcast %14 : f32 to vector<10x128xf32>
    %285 = arith.mulf %284, %277 : vector<10x128xf32>
    %286 = vector.broadcast %15 : f32 to vector<10x128xf32>
    %287 = arith.mulf %286, %278 : vector<10x128xf32>
    %288 = arith.addf %285, %287 : vector<10x128xf32>
    %289 = arith.addf %275, %283 : vector<10x128xf32>
    %290 = arith.addf %276, %288 : vector<10x128xf32>
    %c0_243 = arith.constant 0 : index
    %c0_244 = arith.constant 0 : index
    %c0_245 = arith.constant 0 : index
    %291 = vector.load %arg8[%c0_243, %c0_244, %c0_245] : memref<1x10x128xf32, #tpu.memory_space<vmem>>, vector<1x10x128xf32>
    %292 = vector.shape_cast %291 : vector<1x10x128xf32> to vector<10x128xf32>
    %293 = vector.shape_cast %290 : vector<10x128xf32> to vector<1x10x128xf32>
    tpu.vector_store %arg8[%c0_243, %c0_244, %c0_245], %293 {strides = array<i32>} : memref<1x10x128xf32, #tpu.memory_space<vmem>>, vector<1x10x128xf32>,
    %c0_246 = arith.constant 0 : index
    %c0_247 = arith.constant 0 : index
    %c0_248 = arith.constant 0 : index
    %294 = vector.load %arg5[%c0_246, %c0_247, %c0_248] : memref<1x10x128xf32, #tpu.memory_space<vmem>>, vector<1x10x128xf32>
    %295 = vector.shape_cast %294 : vector<1x10x128xf32> to vector<10x128xf32>
    %296 = vector.shape_cast %289 : vector<10x128xf32> to vector<1x10x128xf32>
    tpu.vector_store %arg5[%c0_246, %c0_247, %c0_248], %296 {strides = array<i32>} : memref<1x10x128xf32, #tpu.memory_space<vmem>>, vector<1x10x128xf32>,
    return
  }
  func.func @transform_0(%arg0: i32, %arg1: i32) -> i32 {
    %c0_i32 = arith.constant 0 : i32
    %c0_i32_0 = arith.constant 0 : i32
    return %c0_i32 : i32
  }
  func.func @transform_1(%arg0: i32, %arg1: i32) -> i32 {
    %c0_i32 = arith.constant 0 : i32
    %c0_i32_0 = arith.constant 0 : i32
    return %c0_i32 : i32
  }
  func.func @transform_2(%arg0: i32, %arg1: i32) -> (i32, i32, i32) {
    %c0_i32 = arith.constant 0 : i32
    %c0_i32_0 = arith.constant 0 : i32
    return %arg0, %c0_i32, %arg1 : i32, i32, i32
  }
  func.func @transform_3(%arg0: i32, %arg1: i32) -> (i32, i32, i32) {
    %c0_i32 = arith.constant 0 : i32
    %c0_i32_0 = arith.constant 0 : i32
    return %arg0, %c0_i32, %arg1 : i32, i32, i32
  }
  func.func @transform_4(%arg0: i32, %arg1: i32) -> (i32, i32, i32) {
    %c0_i32 = arith.constant 0 : i32
    %c0_i32_0 = arith.constant 0 : i32
    return %arg0, %c0_i32, %arg1 : i32, i32, i32
  }
  func.func @transform_5(%arg0: i32, %arg1: i32) -> (i32, i32, i32) {
    %c0_i32 = arith.constant 0 : i32
    %c0_i32_0 = arith.constant 0 : i32
    return %arg0, %c0_i32, %arg1 : i32, i32, i32
  }
  func.func @transform_6(%arg0: i32, %arg1: i32) -> (i32, i32, i32) {
    %c0_i32 = arith.constant 0 : i32
    %c0_i32_0 = arith.constant 0 : i32
    return %arg0, %c0_i32, %arg1 : i32, i32, i32
  }
}

</mosaic_0001>

<bundles_post_ra>
// kernel: tpu_custom_call.1
= control target key start
LH: loop header
LB: loop body
LE: loop exit
PB: predicated region body
PF: predicated region fallthrough
CT: control target
= control target key end

     0   :  { %s1779_s0 = inlined_call_operand.hbm [shape: f32[8], index: 0, kind: input, shape index: {}]   ;;  %s1780_s1 = inlined_call_operand.hbm [shape: f32[8], index: 1, kind: input, shape index: {}]   ;;  %s1781_s2 = inlined_call_operand.hbm [shape: f32[2,32,128], index: 2, kind: input, shape index: {}]   ;;  %s1782_s3 = inlined_call_operand.vmem [shape: f32[2,10,128], index: 3, kind: output, shape index: {0}]   ;;  %s1783_s4 = inlined_call_operand.vmem [shape: f32[2,19,128], index: 4, kind: output, shape index: {1}]   ;;  %s1784_s5 = inlined_call_operand.vmem [shape: f32[2,13,128], index: 5, kind: output, shape index: {2}]   ;;  %s1785_s6 = inlined_call_operand.vmem [shape: f32[2,10,128], index: 6, kind: output, shape index: {3}]  }
   0x1   :  { %1786 = sst [smem:[#allocation14_spill]] %s1779_s0 }
   0x2   :  { %12 = vsyncpa [#allocation7], 0 }
   0x3   :  { %13 = vsyncpa [#allocation9], 0 }
   0x4   :  { %14 = vsyncpa [#allocation6], 0 }
   0x5   :  { %16 = vsyncpa [#allocation6 + $0x1], 0  ;;  %s1336_s21 = smov 0   ;;  %s1338_s22 = smov 0  }
   0x6   :  { %s1340_s23 = smov 0   ;;  %s1342_s24 = smov 0  }
   0x7   :  { %s1344_s25 = smov 0   ;;  %s1346_s26 = smov 0  }
   0x8 LB: > { %s1055_s27 = sadd.s32 4294967295, %s1295_s26   ;;  %s85_s28 = sadd.s32 1, %s1283_s23  ;;  %s1295_s26 = sphi %s1346_s26, %s22_s26   ;;  %s1291_s25 = sphi %s1344_s25, %s1796_s25   ;;  %s1287_s24 = sphi %s1342_s24, %s1795_s24   ;;  %s1283_s23 = sphi %s1340_s23, %s1794_s23   ;;  %s1279_s22 = sphi %s1338_s22, %s1793_s22   ;;  %s1275_s21 = sphi %s1336_s21, %s1792_s21  }
   0x9   : > { %p92_p0 = scmp.ne.s32.totalorder %s1283_s23, %s1279_s22  ;;  %p93_p1 = scmp.eq.s32.totalorder %s1295_s26, 0 }
   0xa   : > { %p98_p2 = scmp.ne.s32.totalorder %s1279_s22, %s1275_s21  ;;  %p1370_p3 = scmp.eq.s32.totalorder %s1055_s27, 0 }
   0xb   : > { %p94_p4 = por %p93_p1, %p92_p0  ;;  %p1057_p5 = scmp.ge.s32.totalorder %s1295_s26, 1 }
   0xc   : > { %p1377_p6 = por %p1370_p3, %p98_p2  ;;  %p221_p7 = scmp.lt.s32.totalorder %s1295_s26, 3 }
   0xd   : > { %s1789_s0 = sld [smem:[#allocation14_spill]]  ;;  %p1122_p10 = scmp.lt.s32.totalorder %s1295_s26, 2 }
   0xe   : > { %p1385_p8 = pnand %p1057_p5, %p221_p7  ;;  %s243_s13 = sshll.u32 %s1780_s1, 4  ;;  %s244_s13 = int_to_ptr.hbm [resolvable:$true] %s243_s13 }
   0xf   : > { %p1397_p12 = pnand %p1122_p10, %p94_p4  ;;  %s1297_s15 = smov [#allocation5]  }
  0x10   : > { %p1109_p9 = pneg %p1385_p8  ;;  %s1298_s16 = smov [#allocation8]  }
  0x11   : > { %s254_s17 = sand.u32 1, %s1283_s23   ;;  %s34_s18 = sadd.s32 1, %s1291_s25 }
  0x12   : > { %p1110_p11 = pnand %p1109_p9, %p1370_p3  ;;  %p36_p13 = scmp.ge.s32.totalorder %s34_s18, 2 }
  0x13   : > { %s233_s9 = sshll.u32 %s1789_s0, 4  ;;  %s1061_s19 = sshll.u32 %s254_s17, 5  ;;  %s234_s9 = int_to_ptr.hbm [resolvable:$true] %s233_s9 }
  0x14   : > { %1112 = dma.hbm_to_smem (!%p1110_p11), %s234_s9, 16, %s1297_s15, [#allocation7]  }
  0x15   : > { %1115 = dma.hbm_to_smem (!%p1110_p11), %s244_s13, 16, %s1298_s16, [#allocation9]  }
  0x16   : > { %s1094_s20 = sshll.u32 %s1291_s25, 5  ;;  %s1798_s18 = smov (%p36_p13, %s34_s18), 0 }
  0x17   : > { %s264_s7 = scalar_lea.hbm %s1781_s2, %s1094_s20  ;;  %s258_s8 = scalar_lea.vmem [#allocation10], %s1061_s19 }
  0x18   : > { %s267_s11 = sshll.u32 %s258_s8, 4  ;;  %s80_s9 = ssub.s32 %s1291_s25, %s1798_s18  ;;  %s268_s11 = int_to_ptr.vmem [resolvable:$true] %s267_s11 }
  0x19   : > { %s265_s12 = sshll.u32 %s264_s7, 4  ;;  %p83_p0 = scmp.eq.s32.totalorder %s80_s9, 0  ;;  %s266_s12 = int_to_ptr.hbm [resolvable:$true] %s265_s12 }
  0x1a   : > { %s255_s15 = scalar_lea.sflag [#allocation6], %s254_s17  ;;  %s1299_s16 = smov 128  }
  0x1b   : > { %s1414_s13 = scalar_select %p83_p0, %s1283_s23, %s85_s28  }
  0x1c   : > { %s1300_s0 = smov 8   ;;  %279 = sbr.rel (%p1385_p8) target bundleno = 162 (0xa2), region = 32 }
  0x1d   : > { %1119 = dma.hbm_to_vmem [thread:$0]  (!%p1397_p12), %s266_s12, 512, %s268_s11, %s255_s15, %s1299_s16, %s1299_s16, %s1300_s0  }
  0x21   : > { %1262 = dma.done.wait (%p1370_p3), [#allocation7], 16  }
  0x22   : > { %1264 = vsyncadd (%p1370_p3), [#allocation7], 4294967280 }
  0x23   : > { %1266 = dma.done.wait (%p1370_p3), [#allocation9], 16  }
  0x24   : > { %1268 = vsyncadd (%p1370_p3), [#allocation9], 4294967280  ;;  %s291_s28 = sand.u32 1, %s1279_s22  }
  0x25   : > { %s1067_s14 = sshll.u32 %s291_s28, 5  ;;  %s292_s0 = scalar_lea.sflag [#allocation6], %s291_s28 }
  0x26   : > { %s1429_s17 = scalar_lea.vmem [#allocation10], %s1067_s14 }
  0x27   : > { %1270 = dma.done.wait (%p1377_p6), %s292_s0, 512  }
  0x28   : > { %1272 = vsyncadd (%p1377_p6), %s292_s0, 4294966784 }
  0x29   : > { %301 = sfence }
  0x2a   : > { %v401_v0 = vld [vmem:[%s1429_s17] sm:$0x1]  ;;  %v403_v1 = vld [vmem:[%s1429_s17 + $0x1] sm:$0x1]  ;;  %v405_v2 = vld [vmem:[%s1429_s17 + $0x2] sm:$0x1] }
  0x2b   : > { %402 = vst [vmem:[#allocation3] sm:$0x1] %v401_v0  ;;  %v407_v3 = vld [vmem:[%s1429_s17 + $0x3] sm:$0x1]  ;;  %v409_v4 = vld [vmem:[%s1429_s17 + $0x2] sm:$0x1] }
  0x2c   : > { %404 = vst [vmem:[#allocation4] sm:$0x1] %v403_v1  ;;  %v411_v5 = vld [vmem:[%s1429_s17 + $0x1] sm:$0x1]  ;;  %v1442_v6 = vld [vmem:[%s1429_s17] ss:$2 sm:$0xff] }
  0x2d   : > { %406 = vst [vmem:[#allocation3 + $0x1] sm:$0x1] %v405_v2  ;;  %v1445_v7 = vld [vmem:[%s1429_s17 + $0x10] ss:$2 sm:$0xff]  ;;  %v1448_v8 = vld [vmem:[%s1429_s17 + $0x1] ss:$2 sm:$0xff] }
  0x2e   : > { %408 = vst [vmem:[#allocation4 + $0x1] sm:$0x1] %v407_v3  ;;  %v1452_v9 = vld [vmem:[%s1429_s17 + $0x11] ss:$2 sm:$0xff]  ;;  %s393_s29 = sld [smem:[#allocation8]]  ;;  %p353_p1 = scmp.lt.s32.totalorder %s1287_s24, 1 }
  0x2f   : > { %410 = vst [vmem:[#allocation3 + $0x2] sm:$0x1] %v409_v4  ;;  %v424_v10 = vld [vmem:[%s1429_s17 + $0x1e] sm:$0x1]  ;;  %s1082_s30 = sld [smem:[#allocation8 + $0x1]] }
  0x30   : > { %412 = vst [vmem:[#allocation4 + $0x2] sm:$0x1] %v411_v5  ;;  %v426_v11 = vld [vmem:[%s1429_s17 + $0x1d] sm:$0x1]  ;;  %v428_v12 = vld [vmem:[%s1429_s17 + $0x1c] sm:$0x1] }
  0x31   : > { %416 = vst [vmem:[#allocation3 + $0x3] sm:$0xff] %v1442_v6  ;;  %v430_v13 = vld [vmem:[%s1429_s17 + $0x1d] sm:$0x1]  ;;  %s1083_s10 = sld [smem:[#allocation8 + $0x2]]  ;;  %v432_v14 = vld [vmem:[%s1429_s17 + $0x1e] sm:$0x1] }
  0x32   : > { %417 = vst [vmem:[#allocation3 + $0xb] sm:$0xff] %v1445_v7  ;;  %s1084_s19 = sld [smem:[#allocation8 + $0x3]]  ;;  %v434_v15 = vld [vmem:[%s1429_s17 + $0x1f] sm:$0x1]  ;;  %s1800_s24 = smov (!%p353_p1, %s1287_s24), 1 }
  0x33   : > { %422 = vst [vmem:[#allocation4 + $0x3] sm:$0xff] %v1448_v8  ;;  %s1463_s20 = sld [smem:[#allocation8 + $0x4]]  ;;  %s1098_s15 = smul.u32 24, %s1800_s24 }
  0x34   : > { %423 = vst [vmem:[#allocation4 + $0xb] sm:$0xff] %v1452_v9  ;;  %s1466_s21 = sld [smem:[#allocation8 + $0x5]]  ;;  %v1468_v16 = vstv %s393_s29 }
  0x35   : > { %425 = vst [vmem:[#allocation3 + $0x13] sm:$0x1] %v424_v10  ;;  %s1472_s27 = sld [smem:[#allocation8 + $0x6]]  ;;  %v1474_v18 = vstv %s1082_s30  ;;  %s1599_s30 = scalar_lea.vmem %s1783_s4, %s1098_s15 }
  0x36   : > { %427 = vst [vmem:[#allocation4 + $0x13] sm:$0x1] %v426_v11  ;;  %s1488_s7 = sld [smem:[#allocation8 + $0x7]] }
  0x37   : > { %429 = vst [vmem:[#allocation3 + $0x14] sm:$0x1] %v428_v12  ;;  %v1492_v26 = vstv %s1083_s10  ;;  %s1528_s8 = sld [smem:[#allocation5]]  ;;  %s1703_s10 = sshll.u32 %s1800_s24, 4 }
  0x38   : > { %v1470_v17 = vld [vmem:[#allocation3] sm:$0xff]  ;;  %431 = vst [vmem:[#allocation4 + $0x14] sm:$0x1] %v430_v13  ;;  %v1509_v32 = vstv %s1084_s19  ;;  %s1539_s11 = sld [smem:[#allocation5 + $0x1]] }
  0x39   : > { %v1476_v19 = vld [vmem:[#allocation3 + $0x1] sm:$0xff]  ;;  %v1480_v21 = vld [vmem:[#allocation3 + $0x9] sm:$0xff]  ;;  %433 = vst [vmem:[#allocation3 + $0x15] sm:$0x1] %v432_v14  ;;  %v456_v23 = vmul.f32 %v1468_v16, %v1470_v17  ;;  %v1522_v38 = vstv %s1463_s20  ;;  %s1548_s9 = sld [smem:[#allocation5 + $0x2]]  ;;  %s376_s20 = scalar_lea.vmem %s1784_s5, %s1703_s10 }
  0x3a   : > { %v1478_v20 = vld [vmem:[#allocation3 + $0x8] sm:$0xff]  ;;  %v1486_v24 = vld [vmem:[#allocation4] sm:$0xff]  ;;  %435 = vst [vmem:[#allocation4 + $0x15] sm:$0x1] %v434_v15  ;;  %v484_v31 = vmul.f32 %v1492_v26, %v1476_v19  ;;  %v485_v33 = vmul.f32 %v1492_v26, %v1480_v21  ;;  %v1533_v43 = vstv %s1466_s21  ;;  %v1537_v45 = vld [vmem:[#allocation3 + $0x10] sm:$0x7] }
  0x3b   : > { %v1482_v22 = vld [vmem:[#allocation3 + $0xa] sm:$0xff]  ;;  %v1490_v25 = vld [vmem:[#allocation4 + $0x1] sm:$0xff]  ;;  %v457_v27 = vmul.f32 %v1468_v16, %v1478_v20  ;;  %v1498_v29 = vld [vmem:[#allocation4 + $0x9] sm:$0xff]  ;;  %v460_v30 = vmul.f32 %v1474_v18, %v1486_v24  ;;  %v1544_v48 = vstv %s1472_s27  ;;  %s1560_s12 = sld [smem:[#allocation5 + $0x3]]  ;;  %v458_v60 = vmul.f32 %v1468_v16, %v1537_v45 }
  0x3c   : > { %v1496_v28 = vld [vmem:[#allocation4 + $0x8] sm:$0xff]  ;;  %v488_v35 = vmul.f32 %v1509_v32, %v1490_v25  ;;  %v489_v40 = vmul.f32 %v1509_v32, %v1498_v29  ;;  %v519_v44 = vmul.f32 %v1522_v38, %v1482_v22  ;;  %v1546_v50 = vld [vmem:[#allocation4 + $0x10] sm:$0x7]  ;;  %v552_v51 = vmul.f32 %v1544_v48, %v1442_v6  ;;  %v1556_v55 = vld [vmem:[#allocation3 + $0x11] sm:$0x7]  ;;  %s1570_s16 = sld [smem:[#allocation5 + $0x4]] }
  0x3d   : > { %v1513_v34 = vld [vmem:[#allocation4 + $0xa] sm:$0xff]  ;;  %v1519_v37 = vld [vmem:[#allocation4 + $0x2] sm:$0xff]  ;;  %v461_v39 = vmul.f32 %v1474_v18, %v1496_v28  ;;  %v463_v41 = vadd.f32 %v460_v30, %v456_v23  ;;  %v553_v54 = vmul.f32 %v1445_v7, %v1544_v48  ;;  %v1564_v59 = vstv %s1488_s7  ;;  %s1580_s28 = sld [smem:[#allocation5 + $0x5]]  ;;  %s384_s7 = scalar_lea.vmem %s1785_s6, %s1703_s10 }
  0x3e   : > { %v1517_v36 = vld [vmem:[#allocation3 + $0x2] sm:$0xff]  ;;  %v491_v46 = vadd.f32 %v488_v35, %v484_v31  ;;  %v522_v47 = vmul.f32 %v1533_v43, %v1519_v37  ;;  %v492_v52 = vadd.f32 %v489_v40, %v485_v33  ;;  %v523_v53 = vmul.f32 %v1533_v43, %v1513_v34  ;;  %v1568_v61 = vld [vmem:[#allocation3 + $0x12] sm:$0x7]  ;;  %s1590_s14 = sld [smem:[#allocation5 + $0x6]] }
  0x3f   : > { %v518_v42 = vmul.f32 %v1522_v38, %v1517_v36  ;;  %v464_v49 = vadd.f32 %v461_v39, %v457_v27  ;;  %v1558_v56 = vld [vmem:[#allocation4 + $0x11] sm:$0x7]  ;;  %v556_v62 = vmul.f32 %v1448_v8, %v1564_v59  ;;  %v557_v1 = vmul.f32 %v1452_v9, %v1564_v59  ;;  %s1594_s0 = sld [smem:[#allocation5 + $0x7]] }
  0x40   : > { %v497_v57 = vadd.f32 %v491_v46, %v463_v41  ;;  %v526_v0 = vadd.f32 %v523_v53, %v519_v44  ;;  %v1576_v2 = vld [vmem:[#allocation4 + $0x12] sm:$0x7]  ;;  %v1578_v3 = vld [vmem:[#allocation3 + $0x13] sm:$0x7]  ;;  %v462_v5 = vmul.f32 %v1474_v18, %v1546_v50  ;;  %v486_v10 = vmul.f32 %v1492_v26, %v1556_v55 }
  0x41   : > { %v525_v58 = vadd.f32 %v522_v47, %v518_v42  ;;  %v498_v63 = vadd.f32 %v492_v52, %v464_v49  ;;  %v490_v11 = vmul.f32 %v1509_v32, %v1558_v56  ;;  %v1588_v12 = vld [vmem:[#allocation4 + $0x13] sm:$0x7]  ;;  %v559_v13 = vadd.f32 %v556_v62, %v552_v51 }
  0x42   : > { %v560_v15 = vadd.f32 %v557_v1, %v553_v54  ;;  %v520_v23 = vmul.f32 %v1522_v38, %v1568_v61  ;;  %v465_v27 = vadd.f32 %v462_v5, %v458_v60  ;;  %v524_v31 = vmul.f32 %v1533_v43, %v1576_v2 }
  0x43   : > { %v531_v4 = vadd.f32 %v525_v58, %v497_v57  ;;  %v532_v14 = vadd.f32 %v526_v0, %v498_v63  ;;  %v493_v30 = vadd.f32 %v490_v11, %v486_v10  ;;  %v554_v33 = vmul.f32 %v1544_v48, %v1578_v3 }
  0x44   : > { %v558_v40 = vmul.f32 %v1564_v59, %v1588_v12  ;;  %v1608_v41 = vstv %s1528_s8  ;;  %v527_v44 = vadd.f32 %v524_v31, %v520_v23  ;;  %v1613_v47 = vstv %s1539_s11 }
  0x45   : > { %v565_v35 = vadd.f32 %v559_v13, %v531_v4  ;;  %v566_v39 = vadd.f32 %v560_v15, %v532_v14  ;;  %v499_v42 = vadd.f32 %v493_v30, %v465_v27  ;;  %v445_v46 = vmul.f32 %v1608_v41, %v1470_v17 }
  0x46   : > { %v561_v49 = vadd.f32 %v558_v40, %v554_v33  ;;  %v449_v51 = vmul.f32 %v1613_v47, %v1486_v24  ;;  %v1619_v52 = vstv %s1548_s9  ;;  %v1622_v53 = vstv %s1560_s12  ;;  %s360_s9 = scalar_lea.vmem %s1782_s3, %s1703_s10 }
  0x47   : > { %568 = vst [vmem:[%s1599_s30] sm:$0xff] %v565_v35  ;;  %v533_v54 = vadd.f32 %v527_v44, %v499_v42  ;;  %v473_v57 = vmul.f32 %v1619_v52, %v1476_v19  ;;  %v477_v17 = vmul.f32 %v1622_v53, %v1490_v25  ;;  %v1630_v58 = vstv %s1570_s16 }
  0x48   : > { %569 = vst [vmem:[%s1599_s30 + $0x8] sm:$0xff] %v566_v39  ;;  %v452_v60 = vadd.f32 %v449_v51, %v445_v46  ;;  %v507_v24 = vmul.f32 %v1630_v58, %v1517_v36  ;;  %v1635_v62 = vstv %s1580_s28  ;;  %v1638_v63 = vstv %s1590_s14 }
  0x49   : > { %v567_v0 = vadd.f32 %v561_v49, %v533_v54  ;;  %v480_v1 = vadd.f32 %v477_v17, %v473_v57  ;;  %v511_v4 = vmul.f32 %v1635_v62, %v1519_v37  ;;  %v541_v19 = vmul.f32 %v1638_v63, %v1442_v6 }
  0x4a   : > { %v1645_v5 = vstv %s1594_s0  ;;  %v446_v25 = vmul.f32 %v1608_v41, %v1478_v20  ;;  %v450_v36 = vmul.f32 %v1613_v47, %v1496_v28  ;;  %v474_v10 = vmul.f32 %v1619_v52, %v1480_v21 }
  0x4b   : > { %570 = vst [vmem:[%s1599_s30 + $0x10] sm:$0x7] %v567_v0  ;;  %v494_v11 = vadd.f32 %v480_v1, %v452_v60  ;;  %v514_v13 = vadd.f32 %v511_v4, %v507_v24  ;;  %v545_v37 = vmul.f32 %v1448_v8, %v1645_v5  ;;  %v478_v6 = vmul.f32 %v1622_v53, %v1498_v29 }
  0x4c   : > { %v453_v14 = vadd.f32 %v450_v36, %v446_v25  ;;  %v508_v15 = vmul.f32 %v1630_v58, %v1482_v22  ;;  %v512_v20 = vmul.f32 %v1635_v62, %v1513_v34  ;;  %v542_v28 = vmul.f32 %v1445_v7, %v1638_v63 }
  0x4d   : > { %v528_v21 = vadd.f32 %v514_v13, %v494_v11  ;;  %v548_v23 = vadd.f32 %v545_v37, %v541_v19  ;;  %v481_v27 = vadd.f32 %v478_v6, %v474_v10  ;;  %v546_v30 = vmul.f32 %v1452_v9, %v1645_v5 }
  0x4e   : > { %v515_v8 = vadd.f32 %v512_v20, %v508_v15  ;;  %v447_v29 = vmul.f32 %v1608_v41, %v1537_v45  ;;  %v451_v31 = vmul.f32 %v1613_v47, %v1546_v50  ;;  %v475_v22 = vmul.f32 %v1619_v52, %v1556_v55 }
  0x4f   : > { %v562_v34 = vadd.f32 %v548_v23, %v528_v21  ;;  %v495_v33 = vadd.f32 %v481_v27, %v453_v14  ;;  %v549_v35 = vadd.f32 %v546_v30, %v542_v28  ;;  %v479_v7 = vmul.f32 %v1622_v53, %v1558_v56 }
  0x50   : > { %v454_v39 = vadd.f32 %v451_v31, %v447_v29  ;;  %v509_v9 = vmul.f32 %v1630_v58, %v1568_v61  ;;  %v513_v40 = vmul.f32 %v1635_v62, %v1576_v2  ;;  %v543_v50 = vmul.f32 %v1638_v63, %v1578_v3 }
  0x51   : > { %571 = vst [vmem:[#allocation2] sm:$0xff] %v562_v34  ;;  %v529_v45 = vadd.f32 %v515_v8, %v495_v33  ;;  %v482_v42 = vadd.f32 %v479_v7, %v475_v22  ;;  %v547_v55 = vmul.f32 %v1645_v5, %v1588_v12 }
  0x52   : > { %v516_v49 = vadd.f32 %v513_v40, %v509_v9 }
  0x53   : > { %v563_v44 = vadd.f32 %v549_v35, %v529_v45  ;;  %v496_v46 = vadd.f32 %v482_v42, %v454_v39  ;;  %v550_v51 = vadd.f32 %v547_v55, %v543_v50 }
  0x55   : > { %572 = vst [vmem:[#allocation2 + $0x8] sm:$0xff] %v563_v44  ;;  %v530_v56 = vadd.f32 %v516_v49, %v496_v46 }
  0x57   : > { %v564_v54 = vadd.f32 %v550_v51, %v530_v56 }
  0x58   : > { %v574_v61 = vld [vmem:[#allocation2] sm:$0x1]  ;;  %v576_v57 = vld [vmem:[#allocation2 + $0x1] sm:$0x1]  ;;  %v578_v2 = vld [vmem:[#allocation2 + $0x2] sm:$0x1] }
  0x59   : > { %573 = vst [vmem:[#allocation2 + $0x10] sm:$0x7] %v564_v54  ;;  %v580_v17 = vld [vmem:[#allocation2 + $0x3] sm:$0x1]  ;;  %v582_v60 = vld [vmem:[#allocation2 + $0x2] sm:$0x1] }
  0x5a   : > { %575 = vst [vmem:[#allocation3] sm:$0x1] %v574_v61  ;;  %v584_v3 = vld [vmem:[#allocation2 + $0x1] sm:$0x1] }
  0x5b   : > { %577 = vst [vmem:[#allocation4] sm:$0x1] %v576_v57 }
  0x5c   : > { %579 = vst [vmem:[#allocation3 + $0x1] sm:$0x1] %v578_v2  ;;  %v586_v24 = vld [vmem:[#allocation2] ss:$2 sm:$0xff]  ;;  %v592_v12 = vld [vmem:[#allocation2 + $0x1] ss:$2 sm:$0xff] }
  0x5d   : > { %581 = vst [vmem:[#allocation4 + $0x1] sm:$0x1] %v580_v17  ;;  %v601_v25 = vld [vmem:[#allocation2 + $0xf] sm:$0x1]  ;;  %v671_v11 = vmul.f32 %v586_v24, %v1638_v63  ;;  %v673_v13 = vmul.f32 %v592_v12, %v1645_v5  ;;  %v677_v37 = vmul.f32 %v586_v24, %v1544_v48  ;;  %v679_v6 = vmul.f32 %v592_v12, %v1564_v59 }
  0x5e   : > { %583 = vst [vmem:[#allocation3 + $0x2] sm:$0x1] %v582_v60 }
  0x5f   : > { %585 = vst [vmem:[#allocation4 + $0x2] sm:$0x1] %v584_v3  ;;  %v675_v7 = vadd.f32 %v673_v13, %v671_v11  ;;  %v681_v39 = vadd.f32 %v679_v6, %v677_v37 }
  0x60   : > { %589 = vst [vmem:[#allocation3 + $0x3] sm:$0xff] %v586_v24  ;;  %v588_v0 = vld [vmem:[#allocation2 + $0x10] ss:$2 sm:$0x3]  ;;  %v597_v1 = vld [vmem:[#allocation2 + $0x11] sm:$0x1] }
  0x61   : > { %590 = vst [vmem:[#allocation3 + $0xb] sm:$0x3] %v588_v0  ;;  %v594_v4 = vld [vmem:[#allocation2 + $0x11] ss:$2 sm:$0x1] }
  0x62   : > { %595 = vst [vmem:[#allocation4 + $0x3] sm:$0xff] %v592_v12  ;;  %v599_v19 = vld [vmem:[#allocation2 + $0x10] sm:$0x1]  ;;  %v605_v10 = vld [vmem:[#allocation2 + $0x11] sm:$0x1] }
  0x63   : > { %596 = vst [vmem:[#allocation4 + $0xb] sm:$0x1] %v594_v4  ;;  %v603_v36 = vld [vmem:[#allocation2 + $0x10] sm:$0x1]  ;;  %v607_v14 = vld [vmem:[#allocation2 + $0x12] sm:$0x1] }
  0x64   : > { %598 = vst [vmem:[#allocation4 + $0xc] sm:$0x1] %v597_v1  ;;  %v609_v15 = vld [vmem:[#allocation2 + $0x11] sm:$0x1] }
  0x65   : > { %600 = vst [vmem:[#allocation3 + $0xd] sm:$0x1] %v599_v19 }
  0x66   : > { %602 = vst [vmem:[#allocation4 + $0xd] sm:$0x1] %v601_v25 }
  0x67   : > { %604 = vst [vmem:[#allocation3 + $0xe] sm:$0x1] %v603_v36  ;;  %v611_v20 = vld [vmem:[#allocation3] sm:$0xff] }
  0x68   : > { %v627_v28 = vld [vmem:[#allocation3 + $0x1] sm:$0xff]  ;;  %606 = vst [vmem:[#allocation4 + $0xe] sm:$0x1] %v605_v10  ;;  %v615_v23 = vmul.f32 %v611_v20, %v1608_v41  ;;  %v621_v27 = vmul.f32 %v611_v20, %v1468_v16 }
  0x69   : > { %v647_v21 = vld [vmem:[#allocation3 + $0x2] sm:$0xff]  ;;  %v631_v30 = vmul.f32 %v627_v28, %v1619_v52  ;;  %v637_v8 = vmul.f32 %v627_v28, %v1492_v26  ;;  %608 = vst [vmem:[#allocation3 + $0xf] sm:$0x1] %v607_v14  ;;  %v613_v31 = vld [vmem:[#allocation4] sm:$0xff] }
  0x6a   : > { %v612_v29 = vld [vmem:[#allocation3 + $0x8] sm:$0x1f]  ;;  %v629_v22 = vld [vmem:[#allocation4 + $0x1] sm:$0xff]  ;;  %v651_v33 = vmul.f32 %v647_v21, %v1630_v58  ;;  %v657_v35 = vmul.f32 %v647_v21, %v1522_v38  ;;  %610 = vst [vmem:[#allocation4 + $0xf] sm:$0x1] %v609_v15  ;;  %v617_v9 = vmul.f32 %v613_v31, %v1613_v47  ;;  %v623_v40 = vmul.f32 %v613_v31, %v1474_v18 }
  0x6b   : > { %v649_v34 = vld [vmem:[#allocation4 + $0x2] sm:$0xff]  ;;  %v633_v45 = vmul.f32 %v629_v22, %v1622_v53  ;;  %v639_v42 = vmul.f32 %v629_v22, %v1509_v32  ;;  %v622_v46 = vmul.f32 %v612_v29, %v1468_v16  ;;  %v616_v49 = vmul.f32 %v612_v29, %v1608_v41 }
  0x6c   : > { %v653_v50 = vmul.f32 %v649_v34, %v1635_v62  ;;  %v659_v55 = vmul.f32 %v649_v34, %v1533_v43  ;;  %v614_v44 = vld [vmem:[#allocation4 + $0x8] sm:$0x1f]  ;;  %v619_v56 = vadd.f32 %v617_v9, %v615_v23  ;;  %v625_v51 = vadd.f32 %v623_v40, %v621_v27  ;;  %v628_v57 = vld [vmem:[#allocation3 + $0x9] sm:$0x1f] }
  0x6d   : > { %v635_v54 = vadd.f32 %v633_v45, %v631_v30  ;;  %v641_v61 = vadd.f32 %v639_v42, %v637_v8  ;;  %v624_v60 = vmul.f32 %v614_v44, %v1474_v18  ;;  %v630_v3 = vld [vmem:[#allocation4 + $0x9] sm:$0x1f]  ;;  %v638_v24 = vmul.f32 %v628_v57, %v1492_v26 }
  0x6e   : > { %v655_v2 = vadd.f32 %v653_v50, %v651_v33  ;;  %v661_v17 = vadd.f32 %v659_v55, %v657_v35  ;;  %v640_v1 = vmul.f32 %v630_v3, %v1509_v32  ;;  %v648_v4 = vld [vmem:[#allocation3 + $0xa] sm:$0x1f]  ;;  %v618_v19 = vmul.f32 %v614_v44, %v1613_v47 }
  0x6f   : > { %v643_v12 = vadd.f32 %v635_v54, %v619_v56  ;;  %v645_v0 = vadd.f32 %v641_v61, %v625_v51  ;;  %v626_v25 = vadd.f32 %v624_v60, %v622_v46  ;;  %v650_v36 = vld [vmem:[#allocation4 + $0xa] sm:$0x1f]  ;;  %v658_v10 = vmul.f32 %v648_v4, %v1522_v38 }
  0x70   : > { %v632_v11 = vmul.f32 %v628_v57, %v1619_v52  ;;  %v634_v13 = vmul.f32 %v630_v3, %v1622_v53  ;;  %v642_v14 = vadd.f32 %v640_v1, %v638_v24  ;;  %v660_v15 = vmul.f32 %v650_v36, %v1533_v43  ;;  %v668_v20 = vld [vmem:[#allocation3 + $0xb] sm:$0x1f] }
  0x71   : > { %v663_v37 = vadd.f32 %v655_v2, %v643_v12  ;;  %v665_v6 = vadd.f32 %v661_v17, %v645_v0  ;;  %v670_v28 = vld [vmem:[#allocation4 + $0xb] sm:$0x1f]  ;;  %v678_v21 = vmul.f32 %v668_v20, %v1544_v48  ;;  %v620_v23 = vadd.f32 %v618_v19, %v616_v49 }
  0x72   : > { %v636_v27 = vadd.f32 %v634_v13, %v632_v11  ;;  %v652_v30 = vmul.f32 %v648_v4, %v1630_v58  ;;  %v646_v31 = vadd.f32 %v642_v14, %v626_v25  ;;  %v662_v22 = vadd.f32 %v660_v15, %v658_v10 }
  0x73   : > { %v683_v8 = vadd.f32 %v675_v7, %v663_v37  ;;  %v685_v29 = vadd.f32 %v681_v39, %v665_v6  ;;  %v680_v34 = vmul.f32 %v670_v28, %v1564_v59  ;;  %v654_v35 = vmul.f32 %v650_v36, %v1635_v62 }
  0x74   : > { %v644_v33 = vadd.f32 %v636_v27, %v620_v23  ;;  %v672_v9 = vmul.f32 %v668_v20, %v1638_v63  ;;  %v666_v40 = vadd.f32 %v662_v22, %v646_v31  ;;  %v674_v45 = vmul.f32 %v670_v28, %v1645_v5 }
  0x75   : > { %687 = vst [vmem:[%s376_s20] sm:$0xff] %v685_v29  ;;  %v682_v42 = vadd.f32 %v680_v34, %v678_v21  ;;  %v656_v50 = vadd.f32 %v654_v35, %v652_v30 }
  0x76   : > { %689 = vst [vmem:[#allocation2] sm:$0xff] %v683_v8  ;;  %v676_v7 = vadd.f32 %v674_v45, %v672_v9 }
  0x77   : > { %v686_v55 = vadd.f32 %v682_v42, %v666_v40  ;;  %v664_v44 = vadd.f32 %v656_v50, %v644_v33 }
  0x79   : > { %688 = vst [vmem:[%s376_s20 + $0x8] sm:$0x1f] %v686_v55  ;;  %v684_v39 = vadd.f32 %v676_v7, %v664_v44 }
  0x7b   : > { %690 = vst [vmem:[#allocation2 + $0x8] sm:$0x1f] %v684_v39 }
  0x7d   : > { %v691_v46 = vld [vmem:[#allocation2] sm:$0x1]  ;;  %v693_v49 = vld [vmem:[#allocation2 + $0x1] sm:$0x1]  ;;  %v695_v56 = vld [vmem:[#allocation2 + $0x2] sm:$0x1] }
  0x7e   : > { %692 = vst [vmem:[#allocation3] sm:$0x1] %v691_v46  ;;  %v697_v51 = vld [vmem:[#allocation2 + $0x3] sm:$0x1]  ;;  %v699_v54 = vld [vmem:[#allocation2 + $0x2] sm:$0x1] }
  0x7f   : > { %694 = vst [vmem:[#allocation4] sm:$0x1] %v693_v49  ;;  %v701_v61 = vld [vmem:[#allocation2 + $0x1] sm:$0x1] }
  0x80   : > { %696 = vst [vmem:[#allocation3 + $0x1] sm:$0x1] %v695_v56 }
  0x81   : > { %698 = vst [vmem:[#allocation4 + $0x1] sm:$0x1] %v697_v51 }
  0x82   : > { %700 = vst [vmem:[#allocation3 + $0x2] sm:$0x1] %v699_v54  ;;  %v703_v57 = vld [vmem:[#allocation2] ss:$2 sm:$0x7f] }
  0x83   : > { %702 = vst [vmem:[#allocation4 + $0x2] sm:$0x1] %v701_v61  ;;  %v705_v2 = vld [vmem:[#allocation2 + $0x1] ss:$2 sm:$0x3f] }
  0x84   : > { %704 = vst [vmem:[#allocation3 + $0x3] sm:$0x7f] %v703_v57  ;;  %v707_v17 = vld [vmem:[#allocation2 + $0xb] sm:$0x1]  ;;  %v709_v60 = vld [vmem:[#allocation2 + $0xa] sm:$0x1] }
  0x85   : > { %706 = vst [vmem:[#allocation4 + $0x3] sm:$0x3f] %v705_v2  ;;  %v711_v3 = vld [vmem:[#allocation2 + $0x9] sm:$0x1]  ;;  %v713_v24 = vld [vmem:[#allocation2 + $0xa] sm:$0x1] }
  0x86   : > { %708 = vst [vmem:[#allocation4 + $0x9] sm:$0x1] %v707_v17  ;;  %v715_v12 = vld [vmem:[#allocation2 + $0xb] sm:$0x1]  ;;  %v717_v0 = vld [vmem:[#allocation2 + $0xc] sm:$0x1] }
  0x87   : > { %710 = vst [vmem:[#allocation3 + $0xa] sm:$0x1] %v709_v60  ;;  %v719_v1 = vld [vmem:[#allocation2 + $0xb] sm:$0x1] }
  0x88   : > { %712 = vst [vmem:[#allocation4 + $0xa] sm:$0x1] %v711_v3 }
  0x89   : > { %714 = vst [vmem:[#allocation3 + $0xb] sm:$0x1] %v713_v24 }
  0x8a   : > { %716 = vst [vmem:[#allocation4 + $0xb] sm:$0x1] %v715_v12 }
  0x8b   : > { %718 = vst [vmem:[#allocation3 + $0xc] sm:$0x1] %v717_v0  ;;  %v721_v4 = vld [vmem:[#allocation3] sm:$0xff]  ;;  %v722_v6 = vld [vmem:[#allocation3 + $0x8] sm:$0x3] }
  0x8c   : > { %v737_v19 = vld [vmem:[#allocation3 + $0x1] sm:$0xff]  ;;  %720 = vst [vmem:[#allocation4 + $0xc] sm:$0x1] %v719_v1  ;;  %v723_v36 = vld [vmem:[#allocation4] sm:$0xff]  ;;  %v731_v10 = vmul.f32 %v721_v4, %v1468_v16  ;;  %v725_v14 = vmul.f32 %v721_v4, %v1608_v41  ;;  %v732_v23 = vmul.f32 %v722_v6, %v1468_v16 }
  0x8d   : > { %v757_v25 = vld [vmem:[#allocation3 + $0x2] sm:$0xff]  ;;  %v739_v11 = vld [vmem:[#allocation4 + $0x1] sm:$0xff]  ;;  %v747_v13 = vmul.f32 %v737_v19, %v1492_v26  ;;  %v733_v15 = vmul.f32 %v723_v36, %v1474_v18  ;;  %v727_v27 = vmul.f32 %v723_v36, %v1613_v47  ;;  %v741_v22 = vmul.f32 %v737_v19, %v1619_v52 }
  0x8e   : > { %v767_v37 = vmul.f32 %v757_v25, %v1522_v38  ;;  %v749_v20 = vmul.f32 %v739_v11, %v1509_v32  ;;  %v759_v28 = vld [vmem:[#allocation4 + $0x2] sm:$0xff]  ;;  %v777_v8 = vld [vmem:[#allocation3 + $0x3] sm:$0xff]  ;;  %v743_v34 = vmul.f32 %v739_v11, %v1622_v53 }
  0x8f   : > { %v724_v21 = vld [vmem:[#allocation4 + $0x8] sm:$0x3]  ;;  %v769_v30 = vmul.f32 %v759_v28, %v1533_v43  ;;  %v738_v31 = vld [vmem:[#allocation3 + $0x9] sm:$0x3]  ;;  %v735_v33 = vadd.f32 %v733_v15, %v731_v10  ;;  %v787_v40 = vmul.f32 %v777_v8, %v1544_v48  ;;  %v729_v49 = vadd.f32 %v727_v27, %v725_v14 }
  0x90   : > { %v734_v29 = vmul.f32 %v724_v21, %v1474_v18  ;;  %v751_v35 = vadd.f32 %v749_v20, %v747_v13  ;;  %v779_v9 = vld [vmem:[#allocation4 + $0x3] sm:$0xff]  ;;  %v748_v16 = vmul.f32 %v738_v31, %v1492_v26  ;;  %v758_v18 = vld [vmem:[#allocation3 + $0xa] sm:$0x3]  ;;  %v745_v56 = vadd.f32 %v743_v34, %v741_v22 }
  0x91   : > { %v740_v45 = vld [vmem:[#allocation4 + $0x9] sm:$0x3]  ;;  %v771_v42 = vadd.f32 %v769_v30, %v767_v37  ;;  %v789_v50 = vmul.f32 %v779_v9, %v1564_v59  ;;  %v768_v46 = vmul.f32 %v758_v18, %v1522_v38  ;;  %v761_v26 = vmul.f32 %v757_v25, %v1630_v58 }
  0x92   : > { %v736_v55 = vadd.f32 %v734_v29, %v732_v23  ;;  %v750_v44 = vmul.f32 %v740_v45, %v1509_v32  ;;  %v755_v7 = vadd.f32 %v751_v35, %v735_v33  ;;  %v760_v39 = vld [vmem:[#allocation4 + $0xa] sm:$0x3]  ;;  %v778_v57 = vld [vmem:[#allocation3 + $0xb] sm:$0x3]  ;;  %v753_v32 = vadd.f32 %v745_v56, %v729_v49 }
  0x93   : > { %v791_v51 = vadd.f32 %v789_v50, %v787_v40  ;;  %v770_v61 = vmul.f32 %v760_v39, %v1533_v43  ;;  %v780_v17 = vld [vmem:[#allocation4 + $0xb] sm:$0x3]  ;;  %v788_v60 = vmul.f32 %v778_v57, %v1544_v48  ;;  %v763_v3 = vmul.f32 %v759_v28, %v1635_v62 }
  0x94   : > { %v752_v54 = vadd.f32 %v750_v44, %v748_v16  ;;  %v775_v2 = vadd.f32 %v771_v42, %v755_v7  ;;  %v790_v12 = vmul.f32 %v780_v17, %v1564_v59  ;;  %v781_v43 = vmul.f32 %v777_v8, %v1638_v63 }
  0x95   : > { %v772_v24 = vadd.f32 %v770_v61, %v768_v46  ;;  %v765_v1 = vadd.f32 %v763_v3, %v761_v26  ;;  %v783_v4 = vmul.f32 %v779_v9, %v1645_v5  ;;  %v726_v48 = vmul.f32 %v722_v6, %v1608_v41 }
  0x96   : > { %v756_v38 = vadd.f32 %v752_v54, %v736_v55  ;;  %v795_v0 = vadd.f32 %v791_v51, %v775_v2  ;;  %v792_v25 = vadd.f32 %v790_v12, %v788_v60  ;;  %v728_v36 = vmul.f32 %v724_v21, %v1613_v47 }
  0x97   : > { %v742_v10 = vmul.f32 %v738_v31, %v1619_v52  ;;  %v773_v11 = vadd.f32 %v765_v1, %v753_v32  ;;  %v785_v13 = vadd.f32 %v783_v4, %v781_v43  ;;  %v744_v59 = vmul.f32 %v740_v45, %v1622_v53 }
  0x98   : > { %v776_v19 = vadd.f32 %v772_v24, %v756_v38  ;;  %797 = vst [vmem:[%s384_s7] sm:$0xff] %v795_v0  ;;  %v762_v37 = vmul.f32 %v758_v18, %v1630_v58  ;;  %v730_v15 = vadd.f32 %v728_v36, %v726_v48  ;;  %v764_v41 = vmul.f32 %v760_v39, %v1635_v62 }
  0x99   : > { %v793_v6 = vadd.f32 %v785_v13, %v773_v11  ;;  %v746_v20 = vadd.f32 %v744_v59, %v742_v10  ;;  %v782_v47 = vmul.f32 %v778_v57, %v1638_v63  ;;  %v784_v52 = vmul.f32 %v780_v17, %v1645_v5 }
  0x9a   : > { %v796_v14 = vadd.f32 %v792_v25, %v776_v19  ;;  %v766_v53 = vadd.f32 %v764_v41, %v762_v37 }
  0x9b   : > { %799 = vst [vmem:[%s360_s9] sm:$0xff] %v793_v6  ;;  %v754_v28 = vadd.f32 %v746_v20, %v730_v15  ;;  %v786_v58 = vadd.f32 %v784_v52, %v782_v47 }
  0x9c   : > { %798 = vst [vmem:[%s384_s7 + $0x8] sm:$0x3] %v796_v14 }
  0x9d   : > { %v774_v21 = vadd.f32 %v766_v53, %v754_v28 }
  0x9f   : > { %v794_v23 = vadd.f32 %v786_v58, %v774_v21 }
  0xa1   : > { %800 = vst [vmem:[%s360_s9 + $0x8] sm:$0x3] %v794_v23 }
  0xa2 PF: > { %s22_s26 = sadd.s32 1, %s1295_s26   ;;  %s1792_s21 = smov %s1279_s22 }
  0xa3   : > { %p19_p2 = scmp.ge.s32.totalorder %s22_s26, 4   ;;  %s1793_s22 = smov %s1283_s23 }
  0xa4   : > { %s1794_s23 = smov %s1414_s13  ;;  %s1795_s24 = smov %s1291_s25 }
  0xa5   : > { %s1796_s25 = smov %s1798_s18  ;;  %21 = sbr.rel (!%p19_p2) target bundleno = 8 (0x8), region = 123 }
  0xaa   :  { %894 = vsyncpa [#allocation6], 1 }
  0xab   :  { %896 = vsyncpa [#allocation6 + $0x1], 1 }
  0xac   :  { %897 = vsyncpa [#allocation7], 1 }
  0xad   :  { %899 = vsyncpa [#allocation7 + $0x1], 1 }
  0xae   :  { %900 = vsyncpa [#allocation9], 1 }

</bundles_post_ra>
